<compile_context>
chip_gen: v6e
topology: v6e:2x2x1
jax: 0.10.0
libtpu: 0.0.40
codegen_flags: <defaults>
</compile_context>

<pallas_src>
import functools

import jax
import jax.numpy as jnp
from jax.experimental import pallas as pl
from jax.experimental.pallas import tpu as pltpu


def _round_up(a: int, m: int) -> int:
    return (a + m - 1) // m * m


def gru_kernel(x_ref, h_ref,
               wzr_x_ref, wzr_h_ref, b_zr_ref,
               wq_x_ref, wq_h_ref, b_q_ref,
               o_ref):
    hp = h_ref.shape[-1]                      # padded hidden width (multiple of 128)

    x = x_ref[...]                            # f32 [tm, d_in]
    h = h_ref[...]                            # f32 [tm, hp]
    xb = x.astype(jnp.bfloat16)               # bf16 copies feed the MXU
    hb = h.astype(jnp.bfloat16)

    # Fused z/r gates: concat([x, h]) @ W_{z|r} split into x-path + h-path dots,
    # producing one lane-dense [tm, 2*hp] pre-activation.
    a_zr = (jnp.dot(xb, wzr_x_ref[...], preferred_element_type=jnp.float32)
            + jnp.dot(hb, wzr_h_ref[...], preferred_element_type=jnp.float32)
            + b_zr_ref[...])
    zr = 1.0 / (1.0 + jnp.exp(-a_zr))         # sigmoid (exp on EUP)
    z = zr[:, :hp]
    r = zr[:, hp:]

    # q = tanh(concat([x, r*h]) @ Wq^T + bq)
    rh = (r * h).astype(jnp.bfloat16)
    a_q = (jnp.dot(xb, wq_x_ref[...], preferred_element_type=jnp.float32)
           + jnp.dot(rh, wq_h_ref[...], preferred_element_type=jnp.float32)
           + b_q_ref[...])
    q = jnp.tanh(a_q)

    # h' = (1 - z) * h + z * q   (f32 elementwise update)
    o_ref[...] = ((1.0 - z) * h + z * q).astype(o_ref.dtype)


@functools.partial(jax.jit, static_argnames=("tm",))
def gru_forward(x, h, params, *, tm=256):
    """x: [..., input_dim], h: [..., hidden_dim] -> new h with h's shape.

    params are torch-layout: w_* of shape [hidden, input+hidden], b_* of shape [hidden].
    """
    out_shape = h.shape
    d_in = x.shape[-1]
    hidden = h.shape[-1]
    n = x.size // d_in

    x2 = x.reshape(n, d_in).astype(jnp.float32)
    h2 = h.reshape(n, hidden).astype(jnp.float32)

    hp = _round_up(hidden, 128)               # lane-dense gate / output width
    np_ = _round_up(n, tm)                    # row padding to a full tile multiple

    # Split each torch-layout weight [hidden, d_in + hidden] into x-path / h-path,
    # transpose to [in, out], zero-pad hidden dims to hp, cast to bf16.
    def split(w):
        wx = jnp.pad(w[:, :d_in].T, ((0, 0), (0, hp - hidden)))
        wh = jnp.pad(w[:, d_in:].T, ((0, hp - hidden), (0, hp - hidden)))
        return wx.astype(jnp.bfloat16), wh.astype(jnp.bfloat16)

    def pad_bias(b):
        return jnp.pad(b, (0, hp - hidden)).reshape(1, hp).astype(jnp.float32)

    wz_x, wz_h = split(params["w_z"])
    wr_x, wr_h = split(params["w_r"])
    wq_x, wq_h = split(params["w_q"])

    # Fuse z and r into one weight block -> MXU output width 2*hp.
    wzr_x = jnp.concatenate([wz_x, wr_x], axis=1)      # [d_in, 2*hp] bf16
    wzr_h = jnp.concatenate([wz_h, wr_h], axis=1)      # [hp,   2*hp] bf16
    b_zr = jnp.concatenate([pad_bias(params["b_z"]), pad_bias(params["b_r"])], axis=1)
    b_q = pad_bias(params["b_q"])

    x_p = jnp.pad(x2, ((0, np_ - n), (0, 0)))
    h_p = jnp.pad(h2, ((0, np_ - n), (0, hp - hidden)))

    full = lambda a: pl.BlockSpec(a.shape, lambda i: (0,) * a.ndim)

    out = pl.pallas_call(
        gru_kernel,
        out_shape=jax.ShapeDtypeStruct((np_, hp), jnp.float32),
        grid_spec=pltpu.PrefetchScalarGridSpec(
            num_scalar_prefetch=0,
            grid=(np_ // tm,),
            in_specs=[
                pl.BlockSpec((tm, d_in), lambda i: (i, 0)),   # x rows
                pl.BlockSpec((tm, hp), lambda i: (i, 0)),     # h rows
                full(wzr_x), full(wzr_h), full(b_zr),
                full(wq_x), full(wq_h), full(b_q),
            ],
            out_specs=pl.BlockSpec((tm, hp), lambda i: (i, 0)),
        ),
        compiler_params=pltpu.CompilerParams(
            dimension_semantics=("parallel",),                # shards rows across TCs
            vmem_limit_bytes=32 * 1024 * 1024,
        ),
    )(x_p, h_p, wzr_x, wzr_h, b_zr, wq_x, wq_h, b_q)

    return out[:n, :hidden].reshape(out_shape)


def init_params(key, input_dim, hidden_dim):
    """Torch nn.Linear-style init: W [hidden, input+hidden], b [hidden]."""
    k = input_dim + hidden_dim
    bound = 1.0 / float(k) ** 0.5
    ks = jax.random.split(key, 6)
    u = lambda kk, shape: jax.random.uniform(kk, shape, jnp.float32, -bound, bound)
    return {
        "w_z": u(ks[0], (hidden_dim, k)), "b_z": u(ks[1], (hidden_dim,)),
        "w_r": u(ks[2], (hidden_dim, k)), "b_r": u(ks[3], (hidden_dim,)),
        "w_q": u(ks[4], (hidden_dim, k)), "b_q": u(ks[5], (hidden_dim,)),
    }


def gru_reference(x, h, p):
    """Plain-JAX GRU cell mirroring the kernel's mixed precision (bf16 MXU, f32 acc)."""
    def lin(inp, w, b):
        return jnp.dot(inp.astype(jnp.bfloat16), w.T.astype(jnp.bfloat16),
                       preferred_element_type=jnp.float32) + b
    xh = jnp.concatenate([x, h], axis=-1)
    z = 1.0 / (1.0 + jnp.exp(-lin(xh, p["w_z"], p["b_z"])))
    r = 1.0 / (1.0 + jnp.exp(-lin(xh, p["w_r"], p["b_r"])))
    xq = jnp.concatenate([x, r * h], axis=-1)
    q = jnp.tanh(lin(xq, p["w_q"], p["b_q"]))
    return (1.0 - z) * h + z * q


if __name__ == "__main__":
    key = jax.random.PRNGKey(0)
    kx, kh, kp = jax.random.split(key, 3)

    # Small shapes consistent with the module defaults (input_dim=hidden_dim=32);
    # 4*128 = 512 rows -> grid of 2 row-tiles at tm=256 (keeps both v7x TCs busy).
    BATCH, SEQ, INPUT_DIM, HIDDEN_DIM = 4, 128, 32, 32

    x = jax.random.normal(kx, (BATCH, SEQ, INPUT_DIM), jnp.float32)
    h = jax.random.normal(kh, (BATCH, SEQ, HIDDEN_DIM), jnp.float32)
    params = init_params(kp, INPUT_DIM, HIDDEN_DIM)

    out = gru_forward(x, h, params, tm=256)
    out = jax.block_until_ready(out)

    ref = gru_reference(x, h, params)
    assert out.shape == h.shape
    assert jnp.allclose(out, ref, atol=1e-3, rtol=1e-3), (
        "mismatch vs reference, max |diff| = %e" % float(jnp.max(jnp.abs(out - ref))))

    print("KERNEL_OK")
</pallas_src>

<mosaic_0001>
module attributes {stable_mosaic.version = 11 : i64} {
  func.func @gru_kernel(%arg0: i32, %arg1: memref<256x32xf32, #tpu.memory_space<vmem>>, %arg2: memref<256x128xf32, #tpu.memory_space<vmem>>, %arg3: memref<32x256xbf16, #tpu.memory_space<vmem>>, %arg4: memref<128x256xbf16, #tpu.memory_space<vmem>>, %arg5: memref<1x256xf32, #tpu.memory_space<vmem>>, %arg6: memref<32x128xbf16, #tpu.memory_space<vmem>>, %arg7: memref<128x128xbf16, #tpu.memory_space<vmem>>, %arg8: memref<1x128xf32, #tpu.memory_space<vmem>>, %arg9: memref<256x128xf32, #tpu.memory_space<vmem>>) attributes {dimension_semantics = [#tpu.dimension_semantics<parallel>], iteration_bounds = array<i64: 2>, scalar_prefetch = 0 : i64, scratch_operands = 0 : i64, tpu.core_type = #tpu.core_type<tc>, window_params = [{transform_indices = @transform_0, window_bounds = array<i64: 256, 32>}, {transform_indices = @transform_1, window_bounds = array<i64: 256, 128>}, {pipeline_mode = #tpu.pipeline_mode<synchronous>, transform_indices = @transform_2, window_bounds = array<i64: 32, 256>}, {pipeline_mode = #tpu.pipeline_mode<synchronous>, transform_indices = @transform_3, window_bounds = array<i64: 128, 256>}, {pipeline_mode = #tpu.pipeline_mode<synchronous>, transform_indices = @transform_4, window_bounds = array<i64: 1, 256>}, {pipeline_mode = #tpu.pipeline_mode<synchronous>, transform_indices = @transform_5, window_bounds = array<i64: 32, 128>}, {pipeline_mode = #tpu.pipeline_mode<synchronous>, transform_indices = @transform_6, window_bounds = array<i64: 128, 128>}, {pipeline_mode = #tpu.pipeline_mode<synchronous>, transform_indices = @transform_7, window_bounds = array<i64: 1, 128>}, {transform_indices = @transform_8, window_bounds = array<i64: 256, 128>}]} {
    %c0 = arith.constant 0 : index
    %c0_0 = arith.constant 0 : index
    %0 = vector.load %arg1[%c0, %c0_0] : memref<256x32xf32, #tpu.memory_space<vmem>>, vector<256x32xf32>
    %c0_1 = arith.constant 0 : index
    %c0_2 = arith.constant 0 : index
    %1 = vector.load %arg2[%c0_1, %c0_2] : memref<256x128xf32, #tpu.memory_space<vmem>>, vector<256x128xf32>
    %2 = arith.truncf %0 : vector<256x32xf32> to vector<256x32xbf16>
    %3 = arith.truncf %1 : vector<256x128xf32> to vector<256x128xbf16>
    %c0_3 = arith.constant 0 : index
    %c0_4 = arith.constant 0 : index
    %4 = vector.load %arg3[%c0_3, %c0_4] : memref<32x256xbf16, #tpu.memory_space<vmem>>, vector<32x256xbf16>
    %cst = arith.constant dense<0.000000e+00> : vector<256x256xf32>
    %5 = tpu.matmul %2, %4, %cst {dimension_numbers = #tpu.dot_dimension_numbers<[1], [0], [0], [1], [0, 0, 1, 1], [], []>} : vector<256x32xbf16>, vector<32x256xbf16>, vector<256x256xf32> -> vector<256x256xf32>
    %c0_5 = arith.constant 0 : index
    %c0_6 = arith.constant 0 : index
    %6 = vector.load %arg4[%c0_5, %c0_6] : memref<128x256xbf16, #tpu.memory_space<vmem>>, vector<128x256xbf16>
    %cst_7 = arith.constant dense<0.000000e+00> : vector<256x256xf32>
    %7 = tpu.matmul %3, %6, %cst_7 {dimension_numbers = #tpu.dot_dimension_numbers<[1], [0], [0], [1], [0, 0, 1, 1], [], []>} : vector<256x128xbf16>, vector<128x256xbf16>, vector<256x256xf32> -> vector<256x256xf32>
    %8 = arith.addf %5, %7 : vector<256x256xf32>
    %c0_8 = arith.constant 0 : index
    %c0_9 = arith.constant 0 : index
    %9 = vector.load %arg5[%c0_8, %c0_9] : memref<1x256xf32, #tpu.memory_space<vmem>>, vector<1x256xf32>
    %10 = vector.broadcast %9 : vector<1x256xf32> to vector<256x256xf32>
    %11 = arith.addf %8, %10 : vector<256x256xf32>
    %cst_10 = arith.constant 0.000000e+00 : f32
    %12 = vector.broadcast %cst_10 : f32 to vector<256x256xf32>
    %13 = arith.subf %12, %11 : vector<256x256xf32>
    %14 = math.exp %13 : vector<256x256xf32>
    %cst_11 = arith.constant 1.000000e+00 : f32
    %15 = vector.broadcast %cst_11 : f32 to vector<256x256xf32>
    %16 = arith.addf %15, %14 : vector<256x256xf32>
    %cst_12 = arith.constant 1.000000e+00 : f32
    %17 = vector.broadcast %cst_12 : f32 to vector<256x256xf32>
    %18 = arith.divf %17, %16 : vector<256x256xf32>
    %19 = vector.extract_strided_slice %18 {offsets = [0, 0], sizes = [256, 128], strides = [1, 1]} : vector<256x256xf32> to vector<256x128xf32>
    %20 = vector.extract_strided_slice %18 {offsets = [0, 128], sizes = [256, 128], strides = [1, 1]} : vector<256x256xf32> to vector<256x128xf32>
    %21 = arith.mulf %20, %1 : vector<256x128xf32>
    %22 = arith.truncf %21 : vector<256x128xf32> to vector<256x128xbf16>
    %c0_13 = arith.constant 0 : index
    %c0_14 = arith.constant 0 : index
    %23 = vector.load %arg6[%c0_13, %c0_14] : memref<32x128xbf16, #tpu.memory_space<vmem>>, vector<32x128xbf16>
    %cst_15 = arith.constant dense<0.000000e+00> : vector<256x128xf32>
    %24 = tpu.matmul %2, %23, %cst_15 {dimension_numbers = #tpu.dot_dimension_numbers<[1], [0], [0], [1], [0, 0, 1, 1], [], []>} : vector<256x32xbf16>, vector<32x128xbf16>, vector<256x128xf32> -> vector<256x128xf32>
    %c0_16 = arith.constant 0 : index
    %c0_17 = arith.constant 0 : index
    %25 = vector.load %arg7[%c0_16, %c0_17] : memref<128x128xbf16, #tpu.memory_space<vmem>>, vector<128x128xbf16>
    %cst_18 = arith.constant dense<0.000000e+00> : vector<256x128xf32>
    %26 = tpu.matmul %22, %25, %cst_18 {dimension_numbers = #tpu.dot_dimension_numbers<[1], [0], [0], [1], [0, 0, 1, 1], [], []>} : vector<256x128xbf16>, vector<128x128xbf16>, vector<256x128xf32> -> vector<256x128xf32>
    %27 = arith.addf %24, %26 : vector<256x128xf32>
    %c0_19 = arith.constant 0 : index
    %c0_20 = arith.constant 0 : index
    %28 = vector.load %arg8[%c0_19, %c0_20] : memref<1x128xf32, #tpu.memory_space<vmem>>, vector<1x128xf32>
    %29 = vector.broadcast %28 : vector<1x128xf32> to vector<256x128xf32>
    %30 = arith.addf %27, %29 : vector<256x128xf32>
    %31 = math.tanh %30 : vector<256x128xf32>
    %cst_21 = arith.constant 1.000000e+00 : f32
    %32 = vector.broadcast %cst_21 : f32 to vector<256x128xf32>
    %33 = arith.subf %32, %19 : vector<256x128xf32>
    %34 = arith.mulf %33, %1 : vector<256x128xf32>
    %35 = arith.mulf %19, %31 : vector<256x128xf32>
    %36 = arith.addf %34, %35 : vector<256x128xf32>
    %c0_22 = arith.constant 0 : index
    %c0_23 = arith.constant 0 : index
    %37 = vector.load %arg9[%c0_22, %c0_23] : memref<256x128xf32, #tpu.memory_space<vmem>>, vector<256x128xf32>
    tpu.vector_store %arg9[%c0_22, %c0_23], %36 {strides = array<i32>} : memref<256x128xf32, #tpu.memory_space<vmem>>, vector<256x128xf32>,
    return
  }
  func.func @transform_0(%arg0: i32) -> (i32, i32) {
    %c0_i32 = arith.constant 0 : i32
    %c0_i32_0 = arith.constant 0 : i32
    return %arg0, %c0_i32 : i32, i32
  }
  func.func @transform_1(%arg0: i32) -> (i32, i32) {
    %c0_i32 = arith.constant 0 : i32
    %c0_i32_0 = arith.constant 0 : i32
    return %arg0, %c0_i32 : i32, i32
  }
  func.func @transform_2(%arg0: i32) -> (i32, i32) {
    %c0_i32 = arith.constant 0 : i32
    %c0_i32_0 = arith.constant 0 : i32
    %c0_i32_1 = arith.constant 0 : i32
    return %c0_i32, %c0_i32_0 : i32, i32
  }
  func.func @transform_3(%arg0: i32) -> (i32, i32) {
    %c0_i32 = arith.constant 0 : i32
    %c0_i32_0 = arith.constant 0 : i32
    %c0_i32_1 = arith.constant 0 : i32
    return %c0_i32, %c0_i32_0 : i32, i32
  }
  func.func @transform_4(%arg0: i32) -> (i32, i32) {
    %c0_i32 = arith.constant 0 : i32
    %c0_i32_0 = arith.constant 0 : i32
    %c0_i32_1 = arith.constant 0 : i32
    return %c0_i32, %c0_i32_0 : i32, i32
  }
  func.func @transform_5(%arg0: i32) -> (i32, i32) {
    %c0_i32 = arith.constant 0 : i32
    %c0_i32_0 = arith.constant 0 : i32
    %c0_i32_1 = arith.constant 0 : i32
    return %c0_i32, %c0_i32_0 : i32, i32
  }
  func.func @transform_6(%arg0: i32) -> (i32, i32) {
    %c0_i32 = arith.constant 0 : i32
    %c0_i32_0 = arith.constant 0 : i32
    %c0_i32_1 = arith.constant 0 : i32
    return %c0_i32, %c0_i32_0 : i32, i32
  }
  func.func @transform_7(%arg0: i32) -> (i32, i32) {
    %c0_i32 = arith.constant 0 : i32
    %c0_i32_0 = arith.constant 0 : i32
    %c0_i32_1 = arith.constant 0 : i32
    return %c0_i32, %c0_i32_0 : i32, i32
  }
  func.func @transform_8(%arg0: i32) -> (i32, i32) {
    %c0_i32 = arith.constant 0 : i32
    %c0_i32_0 = arith.constant 0 : i32
    return %arg0, %c0_i32 : i32, i32
  }
}

</mosaic_0001>

<bundles_post_ra>
// kernel: gru_forward.1
= control target key start
LH: loop header
LB: loop body
LE: loop exit
PB: predicated region body
PF: predicated region fallthrough
CT: control target
= control target key end

     0   :  { %s2869_s27 = smov 0   ;;  %s3642_s0 = inlined_call_operand.vmem [shape: f32[512,32], index: 0, kind: input, shape index: {}]   ;;  %s3643_s1 = inlined_call_operand.vmem [shape: f32[512,128], index: 1, kind: input, shape index: {}]   ;;  %s3644_s2 = inlined_call_operand.vmem [shape: bf16[32,256], index: 2, kind: input, shape index: {}]   ;;  %s3645_s3 = inlined_call_operand.vmem [shape: bf16[128,256], index: 3, kind: input, shape index: {}]   ;;  %s3646_s4 = inlined_call_operand.vmem [shape: f32[1,256], index: 4, kind: input, shape index: {}]   ;;  %s3647_s5 = inlined_call_operand.vmem [shape: bf16[32,128], index: 5, kind: input, shape index: {}]   ;;  %s3648_s6 = inlined_call_operand.vmem [shape: bf16[128,128], index: 6, kind: input, shape index: {}]   ;;  %s3649_s7 = inlined_call_operand.vmem [shape: f32[1,128], index: 7, kind: input, shape index: {}]   ;;  %s3650_s8 = inlined_call_operand.vmem [shape: f32[512,128], index: 8, kind: output, shape index: {}]  }
   0x1 LB: > { %s2192_s28 = sadd.s32 4294967295, %s2821_s27   ;;  %p2196_p0 = scmp.ge.s32.totalorder %s2821_s27, 1  ;;  %s2821_s27 = sphi %s2869_s27, %s18_s27  }
   0x2   : > { %p274_p1 = scmp.lt.s32.totalorder %s2821_s27, 3 }
   0x4   : > { %p275_p2 = pnand %p2196_p0, %p274_p1 }
   0x5   : > { %s2197_s9 = sshll.u32 (!%p275_p2), %s2192_s28, 5 }
   0x6   : > { %278 = sbr.rel (%p275_p2) target bundleno = 638 (0x27e), region = 52  ;;  %p314_p3 = scmp.lt.s32.totalorder (!%p275_p2), %s2197_s9, 63 }
   0xb   : > { %v2407_v0 = vld [vmem:[%s3645_s3 + $0x74] ss:$8 sps:$4 sm:$0xff]   ;;  %v2409_v1 = vld [vmem:[%s3645_s3 + $0x70] ss:$8 sps:$4 sm:$0xff]   ;;  %v2823_v2 = vmov 0   ;;  %s3652_s9 = smov (!%p314_p3, %s2197_s9), 63 }
   0xc   : > { %822 = vmatprep.mubr.bf16.mxu1 %v2823_v2  ;;  %560 = vmatprep.mubr.bf16.mxu0 %v2823_v2  ;;  %v2410_v3 = vld [vmem:[%s3645_s3 + $0x64] ss:$8 sps:$4 sm:$0xff]   ;;  %v2412_v4 = vld [vmem:[%s3645_s3 + $0x60] ss:$8 sps:$4 sm:$0xff]   ;;  %v2413_v5 = vld [vmem:[%s3645_s3 + $0x54] ss:$8 sps:$4 sm:$0xff]  }
   0xd   : > { %528 = vmatprep.subr.bf16.mxu0 %v2407_v0  ;;  %v2415_v6 = vld [vmem:[%s3645_s3 + $0x50] ss:$8 sps:$4 sm:$0xff]   ;;  %s2897_s20 = sshll.u32 %s3652_s9, 3  ;;  %v2422_v7 = vld [vmem:[%s3644_s2 + $0x14] ss:$8 sps:$4 sm:$0xff]   ;;  %vm741_vm0 = vcmask 261120  }
   0xe   : > { %529 = vmatpush1.bf16.msra.mxu0 %v2409_v1  ;;  %v2424_v8 = vld [vmem:[%s3644_s2 + $0x10] ss:$8 sps:$4 sm:$0xff]   ;;  %v2416_v9 = vld [vmem:[%s3645_s3 + $0x44] ss:$8 sps:$4 sm:$0xff]   ;;  %802 = vmatprep.subr.bf16.mxu1 %v2422_v7  ;;  %s2912_s30 = scalar_lea.vmem %s3642_s0, %s2897_s20  ;;  %v2430_v11 = vld [vmem:[%s3644_s2] ss:$8 sps:$4 sm:$0xff]   ;;  %s2959_s12 = scalar_lea.vmem %s3643_s1, %s2897_s20 }
   0xf   : > { %530 = vmatprep.subr.bf16.mxu0 %v2410_v3  ;;  %803 = vmatpush1.bf16.msra.mxu1 %v2424_v8  ;;  %v2428_v10 = vld [vmem:[%s3644_s2 + $0x4] ss:$8 sps:$4 sm:$0xff]   ;;  %v2418_v12 = vld [vmem:[%s3645_s3 + $0x40] ss:$8 sps:$4 sm:$0xff]   ;;  %v2419_v13 = vld [vmem:[%s3645_s3 + $0x34] ss:$8 sps:$4 sm:$0xff]   ;;  %s3513_s23 = scalar_lea.vmem %s3650_s8, %s2897_s20 }
  0x10   : > { %804 = vmatprep.subr.bf16.mxu1 %v2428_v10  ;;  %v332_v14 = vld [vmem:[%s2912_s30] sm:$0xff]  ;;  %v333_v15 = vld [vmem:[%s2912_s30 + $0x8] sm:$0xff]  ;;  %v2421_v17 = vld [vmem:[%s3645_s3 + $0x30] ss:$8 sps:$4 sm:$0xff]  }
  0x11   : > { %v2928_v16 = vpack.c.bf16 %v333_v15, %v332_v14  ;;  %v2425_v18 = vld [vmem:[%s3645_s3 + $0x24] ss:$8 sps:$4 sm:$0xff]   ;;  %v334_v19 = vld [vmem:[%s2912_s30 + $0x10] sm:$0xff]  ;;  %v335_v20 = vld [vmem:[%s2912_s30 + $0x18] sm:$0xff] }
  0x12   : > { %531 = vmatpush1.bf16.msra.mxu0 %v2412_v4  ;;  %v2427_v21 = vld [vmem:[%s3645_s3 + $0x20] ss:$8 sps:$4 sm:$0xff]   ;;  %v2431_v22 = vld [vmem:[%s3645_s3 + $0x14] ss:$8 sps:$4 sm:$0xff]   ;;  %v2947_v23 = vpack.c.bf16 %v335_v20, %v334_v19  ;;  %v2433_v24 = vld [vmem:[%s3645_s3 + $0x10] ss:$8 sps:$4 sm:$0xff]   ;;  %v985_v19 = vlaneseq }
  0x13   : > { %532 = vmatprep.subr.bf16.mxu0 %v2413_v5  ;;  %805 = vmatpush1.bf16.msra.mxu1 %v2430_v11  ;;  %v2434_v25 = vld [vmem:[%s3645_s3 + $0x4] ss:$8 sps:$4 sm:$0xff]   ;;  %v2436_v28 = vld [vmem:[%s3645_s3] ss:$8 sps:$4 sm:$0xff]   ;;  %v2980_v33 = vld [vmem:[%s2959_s12 + $0x10] sm:$0xff] }
  0x14   : > { %v336_v26 = vld [vmem:[%s2912_s30 + $0x20] sm:$0xff]  ;;  %v337_v27 = vld [vmem:[%s2912_s30 + $0x28] sm:$0xff]  ;;  %v2983_v34 = vld [vmem:[%s2959_s12 + $0x18] sm:$0xff] }
  0x15   : > { %v2970_v29 = vld [vmem:[%s2959_s12] sm:$0xff]  ;;  %v2973_v30 = vld [vmem:[%s2959_s12 + $0x8] sm:$0xff]  ;;  %v2975_v31 = vpack.c.bf16 %v337_v27, %v336_v26  ;;  %v338_v35 = vld [vmem:[%s2912_s30 + $0x30] sm:$0xff]  ;;  %v413_v39 = vpack.c.bf16 %v2983_v34, %v2980_v33 }
  0x16   : > { %533 = vmatpush1.bf16.msra.mxu0 %v2415_v6  ;;  %2223 = vmatmul.mubr.msk.bf16.vlgmr.msra.gmra.mxu1 %vm741_vm0, %v2928_v16  ;;  %v412_v32 = vpack.c.bf16 %v2973_v30, %v2970_v29  ;;  %v339_v36 = vld [vmem:[%s2912_s30 + $0x38] sm:$0xff]  ;;  %v340_v40 = vld [vmem:[%s2912_s30 + $0x40] sm:$0xff]  ;;  %v341_v41 = vld [vmem:[%s2912_s30 + $0x48] sm:$0xff] }
  0x17   : > { %534 = vmatprep.subr.bf16.mxu0 %v2416_v9  ;;  %832 = vmatprep.mubr.bf16.mxu1 %v2823_v2  ;;  %v2437_v37 = vld [vmem:[%s3648_s6 + $0x38] sm:$0xff]   ;;  %v2994_v38 = vpack.c.bf16 %v339_v36, %v338_v35  ;;  %v3005_v42 = vld [vmem:[%s2959_s12 + $0x20] sm:$0xff]  ;;  %v3008_v43 = vld [vmem:[%s2959_s12 + $0x28] sm:$0xff]  ;;  %v3010_v44 = vpack.c.bf16 %v341_v41, %v340_v40 }
  0x18   : > { %2310 = vmatprep.subr.bf16.mxu1 %v2437_v37  ;;  %v414_v45 = vpack.c.bf16 %v3008_v43, %v3005_v42  ;;  %v342_v46 = vld [vmem:[%s2912_s30 + $0x50] sm:$0xff]  ;;  %v343_v47 = vld [vmem:[%s2912_s30 + $0x58] sm:$0xff]  ;;  %v344_v52 = vld [vmem:[%s2912_s30 + $0x60] sm:$0xff] }
  0x19   : > { %2311 = vmatpush3.bf16.msra.mxu1 %v2437_v37  ;;  %v3021_v48 = vld [vmem:[%s2959_s12 + $0x30] sm:$0xff]  ;;  %v3024_v49 = vld [vmem:[%s2959_s12 + $0x38] sm:$0xff]  ;;  %v3026_v50 = vpack.c.bf16 %v343_v47, %v342_v46  ;;  %v345_v53 = vld [vmem:[%s2912_s30 + $0x68] sm:$0xff] }
  0x1a   : > { %535 = vmatpush1.bf16.msra.mxu0 %v2418_v12  ;;  %v415_v51 = vpack.c.bf16 %v3024_v49, %v3021_v48  ;;  %v3037_v54 = vld [vmem:[%s2959_s12 + $0x40] sm:$0xff]  ;;  %v3040_v55 = vld [vmem:[%s2959_s12 + $0x48] sm:$0xff]  ;;  %v3042_v56 = vpack.c.bf16 %v345_v53, %v344_v52  ;;  %v346_v58 = vld [vmem:[%s2912_s30 + $0x70] sm:$0xff] }
  0x1b   : > { %536 = vmatprep.subr.bf16.mxu0 %v2419_v13  ;;  %v416_v57 = vpack.c.bf16 %v3040_v55, %v3037_v54  ;;  %v347_v59 = vld [vmem:[%s2912_s30 + $0x78] sm:$0xff]  ;;  %v3053_v60 = vld [vmem:[%s2959_s12 + $0x50] sm:$0xff]  ;;  %v348_v0 = vld [vmem:[%s2912_s30 + $0x80] sm:$0xff] }
  0x1c   : > { %v3056_v61 = vld [vmem:[%s2959_s12 + $0x58] sm:$0xff]  ;;  %v3058_v62 = vpack.c.bf16 %v347_v59, %v346_v58  ;;  %v349_v1 = vld [vmem:[%s2912_s30 + $0x88] sm:$0xff]  ;;  %v3069_v3 = vld [vmem:[%s2959_s12 + $0x60] sm:$0xff] }
  0x1d   : > { %v417_v63 = vpack.c.bf16 %v3056_v61, %v3053_v60  ;;  %v3072_v4 = vld [vmem:[%s2959_s12 + $0x68] sm:$0xff]  ;;  %v3074_v5 = vpack.c.bf16 %v349_v1, %v348_v0  ;;  %v350_v7 = vld [vmem:[%s2912_s30 + $0x90] sm:$0xff]  ;;  %v351_v8 = vld [vmem:[%s2912_s30 + $0x98] sm:$0xff] }
  0x1e   : > { %537 = vmatpush1.bf16.msra.mxu0 %v2421_v17  ;;  %2224 = vmatmul.mubr.msk.bf16.gmra.mxu1 %vm741_vm0, %v2947_v23  ;;  %v418_v6 = vpack.c.bf16 %v3072_v4, %v3069_v3  ;;  %v3085_v9 = vld [vmem:[%s2959_s12 + $0x70] sm:$0xff]  ;;  %v3088_v10 = vld [vmem:[%s2959_s12 + $0x78] sm:$0xff]  ;;  %v3090_v11 = vpack.c.bf16 %v351_v8, %v350_v7  ;;  %v352_v13 = vld [vmem:[%s2912_s30 + $0xa0] sm:$0xff] }
  0x1f   : > { %538 = vmatprep.subr.bf16.mxu0 %v2425_v18  ;;  %842 = vmatprep.mubr.bf16.mxu1 %v2823_v2  ;;  %v419_v12 = vpack.c.bf16 %v3088_v10, %v3085_v9  ;;  %v353_v14 = vld [vmem:[%s2912_s30 + $0xa8] sm:$0xff]  ;;  %v380_v15 = vld [vmem:[%s2959_s12 + $0x80] sm:$0xff]  ;;  %v382_v27 = vld [vmem:[%s2959_s12 + $0x90] sm:$0xff] }
  0x20   : > { %v381_v17 = vld [vmem:[%s2959_s12 + $0x88] sm:$0xff]  ;;  %v3102_v18 = vpack.c.bf16 %v353_v14, %v352_v13  ;;  %v3115_v26 = vld [vmem:[%s3646_s4] sm:$0x3]  ;;  %v358_v47 = vld [vmem:[%s2912_s30 + $0xd0] sm:$0xff] }
  0x21   : > { %v420_v20 = vpack.c.bf16 %v381_v17, %v380_v15  ;;  %v356_v37 = vld [vmem:[%s2912_s30 + $0xc0] sm:$0xff]  ;;  %v385_v41 = vld [vmem:[%s2959_s12 + $0xa8] sm:$0xff]  ;;  %v386_v52 = vld [vmem:[%s2959_s12 + $0xb0] sm:$0xff] }
  0x22   : > { %539 = vmatpush1.bf16.msra.mxu0 %v2427_v21  ;;  %v3104_v21 = vshrl.u32 %v985_v19, 7  ;;  %v384_v40 = vld [vmem:[%s2959_s12 + $0xa0] sm:$0xff]  ;;  %v387_v53 = vld [vmem:[%s2959_s12 + $0xb8] sm:$0xff]  ;;  %v389_v1 = vld [vmem:[%s2959_s12 + $0xc8] sm:$0xff] }
  0x23   : > { %540 = vmatprep.subr.bf16.mxu0 %v2431_v22  ;;  %v422_v46 = vpack.c.bf16 %v385_v41, %v384_v40  ;;  %v423_v58 = vpack.c.bf16 %v387_v53, %v386_v52  ;;  %v360_v59 = vld [vmem:[%s2912_s30 + $0xe0] sm:$0xff]  ;;  %v2438_v7 = vld [vmem:[%s3648_s6 + $0x30] sm:$0xff]   ;;  %v363_v13 = vld [vmem:[%s2912_s30 + $0xf8] sm:$0xff] }
  0x24   : > { %v987_v22 = vsub.s32 0, %v3104_v21  ;;  %v388_v0 = vld [vmem:[%s2959_s12 + $0xc0] sm:$0xff]  ;;  %2312 = vmatprep.subr.bf16.mxu1 %v2438_v7  ;;  %v2440_v14 = vld [vmem:[%s3648_s6 + $0x28] sm:$0xff]   ;;  %v390_v15 = vld [vmem:[%s2959_s12 + $0xd0] sm:$0xff] }
  0x25   : > { %v424_v8 = vpack.c.bf16 %v389_v1, %v388_v0  ;;  %2313 = vmatpush3.bf16.msra.mxu1 %v2438_v7  ;;  %v391_v17 = vld [vmem:[%s2959_s12 + $0xd8] sm:$0xff]  ;;  %v2444_v41 = vld [vmem:[%s3648_s6 + $0x8] sm:$0xff]  }
  0x26   : > { %541 = vmatpush1.bf16.msra.mxu0 %v2433_v24  ;;  %2225 = vmatmul.mubr.msk.bf16.gmra.mxu1 %vm741_vm0, %v2975_v31  ;;  %v354_v24 = vld [vmem:[%s2912_s30 + $0xb0] sm:$0xff]  ;;  %v395_v40 = vld [vmem:[%s2959_s12 + $0xf8] sm:$0xff] }
  0x27   : > { %542 = vmatprep.subr.bf16.mxu0 %v2434_v25  ;;  %852 = vmatprep.mubr.bf16.mxu1 %v2823_v2  ;;  %v355_v25 = vld [vmem:[%s2912_s30 + $0xb8] sm:$0xff] }
  0x28   : > { %v3123_v35 = vpack.c.bf16 %v355_v25, %v354_v24  ;;  %2314 = vmatprep.subr.bf16.mxu1 %v2440_v14  ;;  %v3179_v24 = vld [vmem:[%s3647_s5 + $0x8] sm:$0xff]   ;;  %v392_v25 = vld [vmem:[%s2959_s12 + $0xe0] sm:$0xff] }
  0x29   : > { %2315 = vmatpush3.bf16.msra.mxu1 %v2440_v14 }
  0x2a   : > { %543 = vmatpush1.bf16.msra.mxu0 %v2436_v28  ;;  %v383_v28 = vld [vmem:[%s2959_s12 + $0x98] sm:$0xff] }
  0x2b   : > { %v421_v36 = vpack.c.bf16 %v383_v28, %v382_v27  ;;  %v393_v27 = vld [vmem:[%s2959_s12 + $0xe8] sm:$0xff]  ;;  %2358 = vmatprep.subr.bf16.mxu0 %v3179_v24  ;;  %v2442_v28 = vld [vmem:[%s3648_s6 + $0x18] sm:$0xff]  }
  0x2d   : > { %561 = vmatmul.mubr.bf16.vlgmr.msra.gmra.mxu0 %v412_v32  ;;  %v3121_v32 = vrot.slane %v3115_v26, %v987_v22  ;;  %v2441_v22 = vld [vmem:[%s3648_s6 + $0x20] sm:$0xff]  }
  0x2e   : > { %570 = vmatprep.mubr.bf16.mxu0 %v2823_v2  ;;  %2226 = vmatmul.mubr.msk.bf16.gmra.mxu1 %vm741_vm0, %v2994_v38 }
  0x2f   : > { %862 = vmatprep.mubr.bf16.mxu1 %v2823_v2  ;;  %2316 = vmatprep.subr.bf16.mxu1 %v2441_v22 }
  0x30   : > { %2317 = vmatpush3.bf16.msra.mxu1 %v2441_v22  ;;  %2359 = vmatpush3.bf16.msra.mxu0 %v3179_v24 }
  0x31   : > { %2318 = vmatprep.subr.bf16.mxu1 %v2442_v28 }
  0x34   : > { %2319 = vmatpush3.bf16.msra.mxu1 %v2442_v28 }
  0x35   : > { %571 = vmatmul.mubr.bf16.gmra.mxu0 %v413_v39  ;;  %v357_v39 = vld [vmem:[%s2912_s30 + $0xc8] sm:$0xff] }
  0x36   : > { %580 = vmatprep.mubr.bf16.mxu0 %v2823_v2  ;;  %2227 = vmatmul.mubr.msk.bf16.gmra.mxu1 %vm741_vm0, %v3010_v44 }
  0x37   : > { %872 = vmatprep.mubr.bf16.mxu1 %v2823_v2 }
  0x3d   : > { %581 = vmatmul.mubr.bf16.gmra.mxu0 %v414_v45  ;;  %v3133_v45 = vpack.c.bf16 %v357_v39, %v356_v37  ;;  %v2443_v37 = vld [vmem:[%s3648_s6 + $0x10] sm:$0xff]  }
  0x3e   : > { %590 = vmatprep.mubr.bf16.mxu0 %v2823_v2  ;;  %2228 = vmatmul.mubr.msk.bf16.gmra.mxu1 %vm741_vm0, %v3026_v50  ;;  %v394_v39 = vld [vmem:[%s2959_s12 + $0xf0] sm:$0xff] }
  0x3f   : > { %882 = vmatprep.mubr.bf16.mxu1 %v2823_v2  ;;  %2320 = vmatprep.subr.bf16.mxu1 %v2443_v37 }
  0x40   : > { %2321 = vmatpush3.bf16.msra.mxu1 %v2443_v37 }
  0x41   : > { %2322 = vmatprep.subr.bf16.mxu1 %v2444_v41 }
  0x44   : > { %2323 = vmatpush3.bf16.msra.mxu1 %v2444_v41 }
  0x45   : > { %591 = vmatmul.mubr.bf16.gmra.mxu0 %v415_v51  ;;  %v359_v51 = vld [vmem:[%s2912_s30 + $0xd8] sm:$0xff] }
  0x46   : > { %600 = vmatprep.mubr.bf16.mxu0 %v2823_v2  ;;  %2229 = vmatmul.mubr.msk.bf16.gmra.mxu1 %vm741_vm0, %v3042_v56 }
  0x47   : > { %892 = vmatprep.mubr.bf16.mxu1 %v2823_v2 }
  0x4d   : > { %601 = vmatmul.mubr.bf16.gmra.mxu0 %v416_v57  ;;  %v3143_v57 = vpack.c.bf16 %v359_v51, %v358_v47  ;;  %v2445_v47 = vld [vmem:[%s3648_s6] sm:$0xff]  }
  0x4e   : > { %610 = vmatprep.mubr.bf16.mxu0 %v2823_v2  ;;  %2230 = vmatmul.mubr.msk.bf16.gmra.mxu1 %vm741_vm0, %v3058_v62  ;;  %v3204_v51 = vld [vmem:[%s3647_s5] sm:$0xff]  }
  0x4f   : > { %902 = vmatprep.mubr.bf16.mxu1 %v2823_v2  ;;  %2324 = vmatprep.subr.bf16.mxu1 %v2445_v47 }
  0x50   : > { %2360 = vmatprep.subr.bf16.mxu0 %v3204_v51  ;;  %2325 = vmatpush3.bf16.msra.mxu1 %v2445_v47 }
  0x51   : > { %2361 = vmatpush3.bf16.msra.mxu0 %v3204_v51  ;;  %2394 = vmatprep.subr.bf16.mxu1 %v3179_v24 }
  0x55   : > { %611 = vmatmul.mubr.bf16.gmra.mxu0 %v417_v63  ;;  %v361_v63 = vld [vmem:[%s2912_s30 + $0xe8] sm:$0xff] }
  0x56   : > { %620 = vmatprep.mubr.bf16.mxu0 %v2823_v2  ;;  %2231 = vmatmul.mubr.msk.bf16.gmra.mxu1 %vm741_vm0, %v3074_v5 }
  0x57   : > { %912 = vmatprep.mubr.bf16.mxu1 %v2823_v2 }
  0x5d   : > { %621 = vmatmul.mubr.bf16.gmra.mxu0 %v418_v6  ;;  %v3153_v6 = vpack.c.bf16 %v361_v63, %v360_v59 }
  0x5e   : > { %630 = vmatprep.mubr.bf16.mxu0 %v2823_v2  ;;  %2232 = vmatmul.mubr.msk.bf16.gmra.mxu1 %vm741_vm0, %v3090_v11 }
  0x5f   : > { %922 = vmatprep.mubr.bf16.mxu1 %v2823_v2 }
  0x65   : > { %631 = vmatmul.mubr.bf16.gmra.mxu0 %v419_v12  ;;  %v362_v12 = vld [vmem:[%s2912_s30 + $0xf0] sm:$0xff] }
  0x66   : > { %640 = vmatprep.mubr.bf16.mxu0 %v2823_v2  ;;  %2233 = vmatmul.mubr.msk.bf16.gmra.mxu1 %vm741_vm0, %v3102_v18  ;;  %v3169_v19 = vpack.c.bf16 %v363_v13, %v362_v12 }
  0x67   : > { %932 = vmatprep.mubr.bf16.mxu1 %v2823_v2 }
  0x6d   : > { %641 = vmatmul.mubr.bf16.gmra.mxu0 %v420_v20  ;;  %v425_v20 = vpack.c.bf16 %v391_v17, %v390_v15 }
  0x6e   : > { %650 = vmatprep.mubr.bf16.mxu0 %v2823_v2  ;;  %2234 = vmatmul.mubr.msk.bf16.gmra.mxu1 %vm741_vm0, %v3123_v35 }
  0x6f   : > { %942 = vmatprep.mubr.bf16.mxu1 %v2823_v2 }
  0x75   : > { %651 = vmatmul.mubr.bf16.gmra.mxu0 %v421_v36  ;;  %v426_v36 = vpack.c.bf16 %v393_v27, %v392_v25 }
  0x76   : > { %660 = vmatprep.mubr.bf16.mxu0 %v2823_v2  ;;  %2235 = vmatmul.mubr.msk.bf16.gmra.mxu1 %vm741_vm0, %v3133_v45 }
  0x77   : > { %952 = vmatprep.mubr.bf16.mxu1 %v2823_v2 }
  0x7d   : > { %661 = vmatmul.mubr.bf16.gmra.mxu0 %v422_v46  ;;  %v427_v46 = vpack.c.bf16 %v395_v40, %v394_v39 }
  0x7e   : > { %670 = vmatprep.mubr.bf16.mxu0 %v2823_v2  ;;  %2236 = vmatmul.mubr.msk.bf16.gmra.mxu1 %vm741_vm0, %v3143_v57 }
  0x7f   : > { %962 = vmatprep.mubr.bf16.mxu1 %v2823_v2 }
  0x85   : > { %671 = vmatmul.mubr.bf16.gmra.mxu0 %v423_v58 }
  0x86   : > { %680 = vmatprep.mubr.bf16.mxu0 %v2823_v2  ;;  %2237 = vmatmul.mubr.msk.bf16.gmra.mxu1 %vm741_vm0, %v3153_v6 }
  0x87   : > { %972 = vmatprep.mubr.bf16.mxu1 %v2823_v2 }
  0x8d   : > { %681 = vmatmul.mubr.bf16.gmra.mxu0 %v424_v8 }
  0x8e   : > { %690 = vmatprep.mubr.bf16.mxu0 %v2823_v2  ;;  %2238 = vmatmul.mubr.msk.bf16.gmra.mxu1 %vm741_vm0, %v3169_v19 }
  0x95   : > { %691 = vmatmul.mubr.bf16.gmra.mxu0 %v425_v20 }
  0x96   : > { %700 = vmatprep.mubr.bf16.mxu0 %v2823_v2 }
  0x9d   : > { %701 = vmatmul.mubr.bf16.gmra.mxu0 %v426_v36 }
  0x9e   : > { %710 = vmatprep.mubr.bf16.mxu0 %v2823_v2 }
  0xa5   : > { %711 = vmatmul.mubr.bf16.gmra.mxu0 %v427_v46 }
  0xa6   : > { %2362 = vmatprep.mubr.msk.bf16.mxu0 %vm741_vm0, %v2928_v16 }
  0xad   : > { %2363 = vmatmul.mubr.msk.bf16.vlgmr.msra.gmra.mxu0 %vm741_vm0, %v2947_v23 }
  0xae   : > { %2366 = vmatprep.mubr.msk.bf16.mxu0 %vm741_vm0, %v2975_v31 }
  0xb5   : > { %2367 = vmatmul.mubr.msk.bf16.gmra.mxu0 %vm741_vm0, %v2994_v38 }
  0xb6   : > { %2370 = vmatprep.mubr.msk.bf16.mxu0 %vm741_vm0, %v3010_v44 }
  0xbd   : > { %2371 = vmatmul.mubr.msk.bf16.gmra.mxu0 %vm741_vm0, %v3026_v50 }
  0xbe   : > { %2374 = vmatprep.mubr.msk.bf16.mxu0 %vm741_vm0, %v3042_v56  ;;  %v991_v56 = vsub.s32 1, %v3104_v21 }
  0xc5   : > { %2375 = vmatmul.mubr.msk.bf16.gmra.mxu0 %vm741_vm0, %v3058_v62 }
  0xc6   : > { %2378 = vmatprep.mubr.msk.bf16.mxu0 %vm741_vm0, %v3074_v5 }
  0xcd   : > { %2379 = vmatmul.mubr.msk.bf16.gmra.mxu0 %vm741_vm0, %v3090_v11 }
  0xce   : > { %2382 = vmatprep.mubr.msk.bf16.mxu0 %vm741_vm0, %v3102_v18 }
  0xd5   : > { %2383 = vmatmul.mubr.msk.bf16.gmra.mxu0 %vm741_vm0, %v3123_v35  ;;  %v3241_v35 = vrot.slane %v3115_v26, %v991_v56 }
  0xd6   : > { %2386 = vmatprep.mubr.msk.bf16.mxu0 %vm741_vm0, %v3133_v45  ;;  %v824_v2 = vpop.f32.mrf.mxu1 }
  0xd8   : > { %v826_v16 = vpop.f32.mrf.mxu1 }
  0xda   : > { %v828_v23 = vpop.f32.mrf.mxu1 }
  0xdc   : > { %v830_v31 = vpop.f32.mrf.mxu1 }
  0xdd   : > { %2387 = vmatmul.mubr.msk.bf16.gmra.mxu0 %vm741_vm0, %v3143_v57 }
  0xde   : > { %v834_v38 = vpop.f32.mrf.mxu1 }
  0xe0   : > { %v836_v44 = vpop.f32.mrf.mxu1 }
  0xe2   : > { %v838_v50 = vpop.f32.mrf.mxu1 }
  0xe4   : > { %v840_v62 = vpop.f32.mrf.mxu1 }
  0xe6   : > { %v844_v5 = vpop.f32.mrf.mxu1 }
  0xe8   : > { %v846_v45 = vpop.f32.mrf.mxu1 }
  0xea   : > { %v848_v57 = vpop.f32.mrf.mxu1 }
  0xec   : > { %v850_v0 = vpop.f32.mrf.mxu1 }
  0xed   : > { %v562_v11 = vpop.f32.mrf.mxu0 }
  0xee   : > { %v3238_v18 = vadd.f32 %v824_v2, %v562_v11  ;;  %v854_v8 = vpop.f32.mrf.mxu1 }
  0xef   : > { %v564_v52 = vpop.f32.mrf.mxu0 }
  0xf0   : > { %v827_v53 = vadd.f32 %v826_v16, %v564_v52  ;;  %v856_v26 = vpop.f32.mrf.mxu1 }
  0xf1   : > { %v566_v58 = vpop.f32.mrf.mxu0 }
  0xf2   : > { %v996_v59 = vadd.f32 %v3241_v35, %v827_v53  ;;  %v3244_v63 = vadd.f32 %v828_v23, %v566_v58  ;;  %v858_v25 = vpop.f32.mrf.mxu1 }
  0xf3   : > { %v568_v1 = vpop.f32.mrf.mxu0 }
  0xf4   : > { %v1060_v21 = vsub.f32 0.0, %v996_v59  ;;  %v831_v7 = vadd.f32 %v830_v31, %v568_v1  ;;  %v860_v39 = vpop.f32.mrf.mxu1 }
  0xf5   : > { %v572_v12 = vpop.f32.mrf.mxu0 }
  0xf6   : > { %v1125_v13 = vmul.f32 1.442695, %v1060_v21  ;;  %v998_v14 = vadd.f32 %v3241_v35, %v831_v7  ;;  %v3247_v15 = vadd.f32 %v834_v38, %v572_v12  ;;  %v864_v47 = vpop.f32.mrf.mxu1 }
  0xf7   : > { %v574_v17 = vpop.f32.mrf.mxu0 }
  0xf8   : > { %2447 = vpow2.f32 %v1125_v13  ;;  %v1062_v20 = vsub.f32 0.0, %v998_v14  ;;  %v837_v22 = vadd.f32 %v836_v44, %v574_v17  ;;  %v866_v38 = vpop.f32.mrf.mxu1 }
  0xf9   : > { %v576_v27 = vpop.f32.mrf.mxu0 }
  0xfa   : > { %v1129_v28 = vmul.f32 1.442695, %v1062_v20  ;;  %v1000_v36 = vadd.f32 %v3241_v35, %v837_v22  ;;  %v3250_v37 = vadd.f32 %v838_v50, %v576_v27  ;;  %v868_v11 = vpop.f32.mrf.mxu1 }
  0xfb   : > { %v578_v40 = vpop.f32.mrf.mxu0 }
  0xfc   : > { %2449 = vpow2.f32 %v1129_v28  ;;  %v1064_v41 = vsub.f32 0.0, %v1000_v36  ;;  %v841_v46 = vadd.f32 %v840_v62, %v578_v40  ;;  %v870_v59 = vpop.f32.mrf.mxu1 }
  0xfd   : > { %v582_v2 = vpop.f32.mrf.mxu0 }
  0xfe   : > { %v1133_v16 = vmul.f32 1.442695, %v1064_v41  ;;  %v1002_v23 = vadd.f32 %v3241_v35, %v841_v46  ;;  %v3253_v31 = vadd.f32 %v844_v5, %v582_v2  ;;  %v874_v21 = vpop.f32.mrf.mxu1 }
  0xff   : > { %v584_v44 = vpop.f32.mrf.mxu0 }
 0x100   : > { %2451 = vpow2.f32 %v1133_v16  ;;  %v1066_v56 = vsub.f32 0.0, %v1002_v23  ;;  %v847_v52 = vadd.f32 %v846_v45, %v584_v44  ;;  %v876_v17 = vpop.f32.mrf.mxu1 }
 0x101   : > { %v586_v50 = vpop.f32.mrf.mxu0 }
 0x102   : > { %v1137_v53 = vmul.f32 1.442695, %v1066_v56  ;;  %v3255_v58 = vadd.f32 %v848_v57, %v586_v50  ;;  %v1004_v62 = vadd.f32 %v3241_v35, %v847_v52  ;;  %v878_v57 = vpop.f32.mrf.mxu1 }
 0x103   : > { %v588_v1 = vpop.f32.mrf.mxu0 }
 0x104   : > { %2453 = vpow2.f32 %v1137_v53  ;;  %v1068_v12 = vsub.f32 0.0, %v1004_v62  ;;  %v851_v5 = vadd.f32 %v850_v0, %v588_v1  ;;  %v880_v16 = vpop.f32.mrf.mxu1 }
 0x105   : > { %v2448_v7 = vpop.eup %2447  ;;  %v592_v13 = vpop.f32.mrf.mxu0 }
 0x106   : > { %v3258_v14 = vadd.f32 %v854_v8, %v592_v13  ;;  %v1252_v20 = vadd.f32 1.0, %v2448_v7  ;;  %v1141_v22 = vmul.f32 1.442695, %v1068_v12  ;;  %v1006_v45 = vadd.f32 %v3241_v35, %v851_v5  ;;  %v884_v56 = vpop.f32.mrf.mxu1 }
 0x107   : > { %v594_v27 = vpop.f32.mrf.mxu0 }
 0x108   : > { %2455 = vpow2.f32 %v1141_v22  ;;  %v1070_v36 = vsub.f32 0.0, %v1006_v45  ;;  %v857_v40 = vadd.f32 %v856_v26, %v594_v27  ;;  %v3265_v26 = vpop.f32.mrf.mxu1 }
 0x109   : > { %v2450_v28 = vpop.eup %2449  ;;  %v596_v41 = vpop.f32.mrf.mxu0  ;;  %2457 = vrcp.f32 %v1252_v20 }
 0x10a   : > { %v1254_v46 = vadd.f32 1.0, %v2450_v28  ;;  %v3261_v2 = vadd.f32 %v858_v25, %v596_v41  ;;  %v1145_v0 = vmul.f32 1.442695, %v1070_v36  ;;  %v1008_v8 = vadd.f32 %v3241_v35, %v857_v40  ;;  %v3269_v13 = vpop.f32.mrf.mxu1 }
 0x10b   : > { %v598_v23 = vpop.f32.mrf.mxu0 }
 0x10c   : > { %2459 = vrcp.f32 %v1254_v46  ;;  %v861_v44 = vadd.f32 %v860_v39, %v598_v23  ;;  %v1072_v50 = vsub.f32 0.0, %v1008_v8  ;;  %v3273_v36 = vpop.f32.mrf.mxu1 }
 0x10d   : > { %v2452_v52 = vpop.eup %2451  ;;  %2461 = vpow2.f32 %v1145_v0  ;;  %v602_v53 = vpop.f32.mrf.mxu0 }
 0x10e   : > { %v1010_v62 = vadd.f32 %v3241_v35, %v861_v44  ;;  %v1256_v1 = vadd.f32 1.0, %v2452_v52  ;;  %v1149_v25 = vmul.f32 1.442695, %v1072_v50  ;;  %v3267_v7 = vadd.f32 %v864_v47, %v602_v53  ;;  %v3276_v46 = vpop.f32.mrf.mxu1 }
 0x10f   : > { %v604_v12 = vpop.f32.mrf.mxu0 }
 0x110   : > { %v1074_v5 = vsub.f32 0.0, %v1010_v62  ;;  %2463 = vpow2.f32 %v1149_v25  ;;  %v867_v39 = vadd.f32 %v866_v38, %v604_v12 }
 0x111   : > { %v2454_v20 = vpop.eup %2453  ;;  %v606_v22 = vpop.f32.mrf.mxu0  ;;  %2465 = vrcp.f32 %v1256_v1 }
 0x112   : > { %v1258_v45 = vadd.f32 1.0, %v2454_v20  ;;  %v1153_v27 = vmul.f32 1.442695, %v1074_v5  ;;  %v3271_v28 = vadd.f32 %v868_v11, %v606_v22  ;;  %v1012_v40 = vadd.f32 %v3241_v35, %v867_v39  ;;  %v3281_v11 = vpop.f32.mrf.mxu1 }
 0x113   : > { %v608_v41 = vpop.f32.mrf.mxu0 }
 0x114   : > { %2467 = vrcp.f32 %v1258_v45  ;;  %v871_v47 = vadd.f32 %v870_v59, %v608_v41  ;;  %v1076_v0 = vsub.f32 0.0, %v1012_v40  ;;  %v3283_v1 = vpop.f32.mrf.mxu1 }
 0x115   : > { %2469 = vpow2.f32 %v1153_v27  ;;  %v612_v8 = vpop.f32.mrf.mxu0  ;;  %v2456_v23 = vpop.eup %2455 }
 0x116   : > { %v1014_v38 = vadd.f32 %v3241_v35, %v871_v47  ;;  %v3279_v44 = vadd.f32 %v874_v21, %v612_v8  ;;  %v1157_v52 = vmul.f32 1.442695, %v1076_v0  ;;  %v2458_v53 = vpop.eup %2457  ;;  %v1260_v59 = vadd.f32 1.0, %v2456_v23  ;;  %v3287_v22 = vpop.f32.mrf.mxu1 }
 0x117   : > { %v614_v50 = vpop.f32.mrf.mxu0  ;;  %v1443_v23 = vmul.f32 %v2458_v53, %v2970_v29 }
 0x118   : > { %v1078_v62 = vsub.f32 0.0, %v1014_v38  ;;  %v877_v12 = vadd.f32 %v876_v17, %v614_v50  ;;  %2471 = vpow2.f32 %v1157_v52  ;;  %v3291_v0 = vpop.f32.mrf.mxu1 }
 0x119   : > { %v2460_v25 = vpop.eup %2459  ;;  %v616_v5 = vpop.f32.mrf.mxu0  ;;  %2473 = vrcp.f32 %v1260_v59 }
 0x11a   : > { %v2462_v20 = vpop.eup %2461  ;;  %v3285_v39 = vadd.f32 %v878_v57, %v616_v5  ;;  %v1161_v45 = vmul.f32 1.442695, %v1078_v62  ;;  %v1016_v27 = vadd.f32 %v3241_v35, %v877_v12  ;;  %v1444_v41 = vmul.f32 %v2460_v25, %v2973_v30  ;;  %v3297_v50 = vpop.f32.mrf.mxu1 }
 0x11b   : > { %v1262_v21 = vadd.f32 1.0, %v2462_v20  ;;  %v618_v40 = vpop.f32.mrf.mxu0 }
 0x11c   : > { %v881_v47 = vadd.f32 %v880_v16, %v618_v40  ;;  %v1080_v8 = vsub.f32 0.0, %v1016_v27  ;;  %v1475_v12 = vpack.c.bf16 %v1444_v41, %v1443_v23  ;;  %v3299_v59 = vpop.f32.mrf.mxu1 }
 0x11d   : > { %v622_v17 = vpop.f32.mrf.mxu0  ;;  %v2464_v38 = vpop.eup %2463  ;;  %2475 = vrcp.f32 %v1262_v21 }
 0x11e   : > { %v1018_v57 = vadd.f32 %v3241_v35, %v881_v47  ;;  %v3295_v52 = vadd.f32 %v884_v56, %v622_v17  ;;  %2477 = vpow2.f32 %v1161_v45  ;;  %v1165_v62 = vmul.f32 1.442695, %v1080_v8  ;;  %v2466_v16 = vpop.eup %2465  ;;  %2326 = vmatprep.mubr.bf16.mxu1 %v1475_v12  ;;  %v3305_v45 = vpop.f32.mrf.mxu1 }
 0x11f   : > { %v624_v30 = vpop.f32.mrf.mxu0  ;;  %v1264_v25 = vadd.f32 1.0, %v2464_v38 }
 0x120   : > { %v1082_v5 = vsub.f32 0.0, %v1018_v57  ;;  %v887_v29 = vadd.f32 %v3265_v26, %v624_v30  ;;  %2479 = vpow2.f32 %v1165_v62  ;;  %v3310_v23 = vpop.f32.mrf.mxu1  ;;  %v1445_v57 = vmul.f32 %v2466_v16, %v2980_v33 }
 0x121   : > { %v2468_v20 = vpop.eup %2467  ;;  %v626_v53 = vpop.f32.mrf.mxu0  ;;  %2481 = vrcp.f32 %v1264_v25 }
 0x122   : > { %v2470_v21 = vpop.eup %2469  ;;  %v1169_v56 = vmul.f32 1.442695, %v1082_v5  ;;  %v3303_v27 = vadd.f32 %v3269_v13, %v626_v53  ;;  %v1020_v41 = vadd.f32 %v3241_v35, %v887_v29  ;;  %v1446_v17 = vmul.f32 %v2468_v20, %v2983_v34  ;;  %v3314_v62 = vpop.f32.mrf.mxu1 }
 0x123   : > { %v1266_v40 = vadd.f32 1.0, %v2470_v21  ;;  %v628_v47 = vpop.f32.mrf.mxu0 }
 0x124   : > { %v891_v8 = vadd.f32 %v3273_v36, %v628_v47  ;;  %v1084_v26 = vsub.f32 0.0, %v1020_v41  ;;  %v1476_v25 = vpack.c.bf16 %v1446_v17, %v1445_v57  ;;  %v3319_v20 = vpop.f32.mrf.mxu1 }
 0x125   : > { %2483 = vrcp.f32 %v1266_v40  ;;  %v632_v38 = vpop.f32.mrf.mxu0  ;;  %v2472_v12 = vpop.eup %2471 }
 0x126   : > { %2485 = vpow2.f32 %v1169_v56  ;;  %v1022_v13 = vadd.f32 %v3241_v35, %v891_v8  ;;  %v3317_v30 = vadd.f32 %v3276_v46, %v632_v38  ;;  %v1173_v5 = vmul.f32 1.442695, %v1084_v26  ;;  %2327 = vmatmul.mubr.bf16.vlgmr.msra.gmra.mxu1 %v1476_v25  ;;  %v2474_v33 = vpop.eup %2473  ;;  %v3325_v40 = vpop.f32.mrf.mxu1 }
 0x127   : > { %v634_v36 = vpop.f32.mrf.mxu0  ;;  %v1268_v16 = vadd.f32 1.0, %v2472_v12  ;;  %2396 = vmatpush3.bf16.msra.mxu1 %v3179_v24 }
 0x128   : > { %v1086_v34 = vsub.f32 0.0, %v1022_v13  ;;  %v897_v29 = vadd.f32 %v3281_v11, %v634_v36  ;;  %2395 = vmatprep.subr.bf16.mxu1 %v3204_v51  ;;  %2487 = vpow2.f32 %v1173_v5  ;;  %v3331_v17 = vpop.f32.mrf.mxu1 }
 0x129   : > { %v636_v53 = vpop.f32.mrf.mxu0 }
 0x12a   : > { %v1177_v21 = vmul.f32 1.442695, %v1086_v34  ;;  %v3323_v56 = vadd.f32 %v3283_v1, %v636_v53  ;;  %v2476_v46 = vpop.eup %2475  ;;  %v1024_v41 = vadd.f32 %v3241_v35, %v897_v29  ;;  %v3337_v13 = vpop.f32.mrf.mxu1 }
 0x12b   : > { %v638_v47 = vpop.f32.mrf.mxu0  ;;  %v2478_v8 = vpop.eup %2477  ;;  %2397 = vmatpush3.bf16.msra.mxu1 %v3204_v51  ;;  %v1448_v36 = vmul.f32 %v2476_v46, %v3008_v43 }
 0x12c   : > { %v901_v11 = vadd.f32 %v3287_v22, %v638_v47  ;;  %v1270_v26 = vadd.f32 1.0, %v2478_v8  ;;  %2489 = vpow2.f32 %v1177_v21  ;;  %v1088_v1 = vsub.f32 0.0, %v1024_v41  ;;  %v3342_v29 = vpop.f32.mrf.mxu1 }
 0x12d   : > { %v642_v38 = vpop.f32.mrf.mxu0  ;;  %2491 = vrcp.f32 %v1268_v16  ;;  %v2480_v12 = vpop.eup %2479  ;;  %v1447_v22 = vmul.f32 %v2474_v33, %v3005_v42 }
 0x12e   : > { %v1026_v57 = vadd.f32 %v3241_v35, %v901_v11  ;;  %v3335_v24 = vadd.f32 %v3291_v0, %v642_v38  ;;  %2493 = vrcp.f32 %v1270_v26  ;;  %v1181_v25 = vmul.f32 1.442695, %v1088_v1  ;;  %v2482_v53 = vpop.eup %2481  ;;  %v3345_v8 = vpop.f32.mrf.mxu1 }
 0x12f   : > { %v644_v5 = vpop.f32.mrf.mxu0  ;;  %v1477_v16 = vpack.c.bf16 %v1448_v36, %v1447_v22  ;;  %v1272_v41 = vadd.f32 1.0, %v2480_v12 }
 0x130   : > { %v1090_v34 = vsub.f32 0.0, %v1026_v57  ;;  %v907_v47 = vadd.f32 %v3297_v50, %v644_v5  ;;  %2495 = vpow2.f32 %v1181_v25  ;;  %v3353_v38 = vpop.f32.mrf.mxu1  ;;  %v1449_v25 = vmul.f32 %v2482_v53, %v3021_v48 }
 0x131   : > { %v646_v21 = vpop.f32.mrf.mxu0  ;;  %2330 = vmatprep.mubr.bf16.mxu1 %v1477_v16  ;;  %2497 = vrcp.f32 %v1272_v41 }
 0x132   : > { %v2484_v0 = vpop.eup %2483  ;;  %v1185_v11 = vmul.f32 1.442695, %v1090_v34  ;;  %v3348_v42 = vadd.f32 %v3299_v59, %v646_v21  ;;  %v1028_v46 = vadd.f32 %v3241_v35, %v907_v47  ;;  %v3357_v22 = vpop.f32.mrf.mxu1 }
 0x133   : > { %v2486_v51 = vpop.eup %2485  ;;  %v648_v43 = vpop.f32.mrf.mxu0  ;;  %v1450_v1 = vmul.f32 %v2484_v0, %v3024_v49 }
 0x134   : > { %v1274_v33 = vadd.f32 1.0, %v2486_v51  ;;  %v911_v26 = vadd.f32 %v3305_v45, %v648_v43  ;;  %v1092_v57 = vsub.f32 0.0, %v1028_v46  ;;  %v3362_v34 = vpop.f32.mrf.mxu1 }
 0x135   : > { %v652_v50 = vpop.f32.mrf.mxu0  ;;  %v1478_v49 = vpack.c.bf16 %v1450_v1, %v1449_v25  ;;  %v2488_v16 = vpop.eup %2487 }
 0x136   : > { %v1030_v12 = vadd.f32 %v3241_v35, %v911_v26  ;;  %2499 = vrcp.f32 %v1274_v33  ;;  %v3360_v59 = vadd.f32 %v3310_v23, %v652_v50  ;;  %v1189_v45 = vmul.f32 1.442695, %v1092_v57  ;;  %v3365_v48 = vpop.f32.mrf.mxu1 }
 0x137   : > { %v654_v36 = vpop.f32.mrf.mxu0  ;;  %2501 = vpow2.f32 %v1185_v11  ;;  %2331 = vmatmul.mubr.bf16.gmra.mxu1 %v1478_v49  ;;  %v1276_v43 = vadd.f32 1.0, %v2488_v16 }
 0x138   : > { %v1094_v5 = vsub.f32 0.0, %v1030_v12  ;;  %v917_v41 = vadd.f32 %v3314_v62, %v654_v36  ;;  %2503 = vpow2.f32 %v1189_v45  ;;  %v3372_v26 = vpop.f32.mrf.mxu1 }
 0x139   : > { %v656_v21 = vpop.f32.mrf.mxu0  ;;  %v2490_v0 = vpop.eup %2489 }
 0x13a   : > { %v2492_v53 = vpop.eup %2491  ;;  %v1193_v47 = vmul.f32 1.442695, %v1094_v5  ;;  %v3368_v23 = vadd.f32 %v3319_v20, %v656_v21  ;;  %v1032_v33 = vadd.f32 %v3241_v35, %v917_v41  ;;  %v1278_v1 = vadd.f32 1.0, %v2490_v0  ;;  %v3377_v25 = vpop.f32.mrf.mxu1 }
 0x13b   : > { %v658_v51 = vpop.f32.mrf.mxu0  ;;  %v2494_v11 = vpop.eup %2493  ;;  %v1451_v20 = vmul.f32 %v2492_v53, %v3037_v54 }
 0x13c   : > { %v921_v46 = vadd.f32 %v3325_v40, %v658_v51  ;;  %v1452_v62 = vmul.f32 %v2494_v11, %v3040_v55  ;;  %v1096_v57 = vsub.f32 0.0, %v1032_v33  ;;  %2505 = vpow2.f32 %v1193_v47  ;;  %v3382_v21 = vpop.f32.mrf.mxu1 }
 0x13d   : > { %v662_v50 = vpop.f32.mrf.mxu0  ;;  %v2496_v5 = vpop.eup %2495  ;;  %2507 = vrcp.f32 %v1276_v43 }
 0x13e   : > { %v1034_v12 = vadd.f32 %v3241_v35, %v921_v46  ;;  %v3380_v36 = vadd.f32 %v3331_v17, %v662_v50  ;;  %v1197_v40 = vmul.f32 1.442695, %v1096_v57  ;;  %v1479_v16 = vpack.c.bf16 %v1452_v62, %v1451_v20  ;;  %v3385_v41 = vpop.f32.mrf.mxu1  ;;  %v2498_v53 = vpop.eup %2497 }
 0x13f   : > { %v664_v45 = vpop.f32.mrf.mxu0  ;;  %2509 = vrcp.f32 %v1278_v1  ;;  %v1280_v47 = vadd.f32 1.0, %v2496_v5  ;;  %v1453_v20 = vmul.f32 %v2498_v53, %v3053_v60 }
 0x140   : > { %v1098_v49 = vsub.f32 0.0, %v1034_v12  ;;  %2334 = vmatprep.mubr.bf16.mxu1 %v1479_v16  ;;  %v927_v54 = vadd.f32 %v3337_v13, %v664_v45  ;;  %2511 = vpow2.f32 %v1197_v40  ;;  %v3392_v46 = vpop.f32.mrf.mxu1 }
 0x141   : > { %v666_v55 = vpop.f32.mrf.mxu0 }
 0x142   : > { %v1201_v0 = vmul.f32 1.442695, %v1098_v49  ;;  %v3388_v17 = vadd.f32 %v3342_v29, %v666_v55  ;;  %v1036_v43 = vadd.f32 %v3241_v35, %v927_v54  ;;  %v3395_v12 = vpop.f32.mrf.mxu1 }
 0x143   : > { %v668_v51 = vpop.f32.mrf.mxu0  ;;  %v2500_v11 = vpop.eup %2499 }
 0x144   : > { %v931_v33 = vadd.f32 %v3345_v8, %v668_v51  ;;  %v2502_v1 = vpop.eup %2501  ;;  %2513 = vpow2.f32 %v1201_v0  ;;  %v1100_v13 = vsub.f32 0.0, %v1036_v43  ;;  %v1454_v45 = vmul.f32 %v2500_v11, %v3056_v61  ;;  %v3402_v40 = vpop.f32.mrf.mxu1 }
 0x145   : > { %v672_v50 = vpop.f32.mrf.mxu0  ;;  %v1282_v62 = vadd.f32 1.0, %v2502_v1  ;;  %2515 = vrcp.f32 %v1280_v47  ;;  %v2504_v49 = vpop.eup %2503 }
 0x146   : > { %v1038_v57 = vadd.f32 %v3241_v35, %v931_v33  ;;  %v3398_v29 = vadd.f32 %v3353_v38, %v672_v50  ;;  %v1205_v5 = vmul.f32 1.442695, %v1100_v13  ;;  %v1480_v55 = vpack.c.bf16 %v1454_v45, %v1453_v20  ;;  %v960_v11 = vpop.f32.mrf.mxu1 }
 0x147   : > { %v674_v8 = vpop.f32.mrf.mxu0  ;;  %2517 = vrcp.f32 %v1282_v62  ;;  %v1284_v51 = vadd.f32 1.0, %v2504_v49 }
 0x148   : > { %v1102_v16 = vsub.f32 0.0, %v1038_v57  ;;  %v937_v54 = vadd.f32 %v3357_v22, %v674_v8  ;;  %2519 = vpow2.f32 %v1205_v5  ;;  %2335 = vmatmul.mubr.bf16.gmra.mxu1 %v1480_v55  ;;  %v964_v8 = vpop.f32.mrf.mxu1 }
 0x149   : > { %v676_v0 = vpop.f32.mrf.mxu0  ;;  %v2506_v53 = vpop.eup %2505  ;;  %2521 = vrcp.f32 %v1284_v51 }
 0x14a   : > { %v3406_v38 = vadd.f32 %v3362_v34, %v676_v0  ;;  %v1040_v61 = vadd.f32 %v3241_v35, %v937_v54  ;;  %v2508_v43 = vpop.eup %2507  ;;  %v1286_v33 = vadd.f32 1.0, %v2506_v53  ;;  %v1209_v1 = vmul.f32 1.442695, %v1102_v16 }
 0x14b   : > { %v678_v60 = vpop.f32.mrf.mxu0  ;;  %v1455_v45 = vmul.f32 %v2508_v43, %v3069_v3  ;;  %v966_v3 = vpop.f32.mrf.mxu1 }
 0x14c   : > { %v941_v47 = vadd.f32 %v3365_v48, %v678_v60  ;;  %v2510_v62 = vpop.eup %2509  ;;  %v1104_v13 = vsub.f32 0.0, %v1040_v61  ;;  %2523 = vrcp.f32 %v1286_v33 }
 0x14d   : > { %v682_v50 = vpop.f32.mrf.mxu0  ;;  %v2512_v20 = vpop.eup %2511  ;;  %2525 = vpow2.f32 %v1209_v1  ;;  %v1456_v49 = vmul.f32 %v2510_v62, %v3072_v4 }
 0x14e   : > { %v1042_v22 = vadd.f32 %v3241_v35, %v941_v47  ;;  %v3412_v57 = vadd.f32 %v3372_v26, %v682_v50  ;;  %v1213_v48 = vmul.f32 1.442695, %v1104_v13  ;;  %v1288_v54 = vadd.f32 1.0, %v2512_v20 }
 0x14f   : > { %v684_v34 = vpop.f32.mrf.mxu0  ;;  %v1481_v51 = vpack.c.bf16 %v1456_v49, %v1455_v45  ;;  %v968_v45 = vpop.f32.mrf.mxu1 }
 0x150   : > { %v1106_v5 = vsub.f32 0.0, %v1042_v22  ;;  %v947_v55 = vadd.f32 %v3377_v25, %v684_v34  ;;  %2527 = vpow2.f32 %v1213_v48 }
 0x151   : > { %v686_v16 = vpop.f32.mrf.mxu0  ;;  %v2514_v0 = vpop.eup %2513  ;;  %2338 = vmatprep.mubr.bf16.mxu1 %v1481_v51  ;;  %2529 = vrcp.f32 %v1288_v54 }
 0x152   : > { %v2516_v26 = vpop.eup %2515  ;;  %v1290_v53 = vadd.f32 1.0, %v2514_v0  ;;  %v1044_v61 = vadd.f32 %v3241_v35, %v947_v55  ;;  %v3419_v47 = vadd.f32 %v3382_v21, %v686_v16  ;;  %v1217_v33 = vmul.f32 1.442695, %v1106_v5 }
 0x153   : > { %v688_v60 = vpop.f32.mrf.mxu0  ;;  %v1457_v20 = vmul.f32 %v2516_v26, %v3085_v9  ;;  %v970_v9 = vpop.f32.mrf.mxu1 }
 0x154   : > { %v2518_v43 = vpop.eup %2517  ;;  %v951_v4 = vadd.f32 %v3385_v41, %v688_v60  ;;  %v1108_v25 = vsub.f32 0.0, %v1044_v61  ;;  %2531 = vrcp.f32 %v1290_v53 }
 0x155   : > { %v692_v1 = vpop.f32.mrf.mxu0  ;;  %v1458_v13 = vmul.f32 %v2518_v43, %v3088_v10  ;;  %v2520_v21 = vpop.eup %2519  ;;  %2533 = vpow2.f32 %v1217_v33 }
 0x156   : > { %v3423_v50 = vadd.f32 %v3392_v46, %v692_v1  ;;  %v1046_v62 = vadd.f32 %v3241_v35, %v951_v4  ;;  %v1221_v34 = vmul.f32 1.442695, %v1108_v25  ;;  %v1292_v5 = vadd.f32 1.0, %v2520_v21  ;;  %v2522_v0 = vpop.eup %2521  ;;  %v2767_v25 = vld [vmem:[%s2959_s12 + $0x80] sm:$0xff] }
 0x157   : > { %v694_v22 = vpop.f32.mrf.mxu0  ;;  %v1482_v49 = vpack.c.bf16 %v1458_v13, %v1457_v20 }
 0x158   : > { %v1110_v48 = vsub.f32 0.0, %v1046_v62  ;;  %v957_v46 = vadd.f32 %v3395_v12, %v694_v22  ;;  %2535 = vpow2.f32 %v1221_v34  ;;  %v1459_v62 = vmul.f32 %v2767_v25, %v2522_v0  ;;  %v974_v22 = vpop.f32.mrf.mxu1 }
 0x159   : > { %v696_v41 = vpop.f32.mrf.mxu0  ;;  %2339 = vmatmul.mubr.bf16.gmra.mxu1 %v1482_v49  ;;  %v2524_v51 = vpop.eup %2523  ;;  %2537 = vrcp.f32 %v1292_v5 }
 0x15a   : > { %v1225_v16 = vmul.f32 1.442695, %v1110_v48  ;;  %v1048_v10 = vadd.f32 %v3241_v35, %v957_v46  ;;  %v3431_v54 = vadd.f32 %v3402_v40, %v696_v41  ;;  %v2526_v53 = vpop.eup %2525  ;;  %v2768_v40 = vld [vmem:[%s2959_s12 + $0x88] sm:$0xff] }
 0x15b   : > { %v698_v55 = vpop.f32.mrf.mxu0  ;;  %v1294_v12 = vadd.f32 1.0, %v2526_v53  ;;  %v1460_v13 = vmul.f32 %v2768_v40, %v2524_v51 }
 0x15c   : > { %v961_v60 = vadd.f32 %v960_v11, %v698_v55  ;;  %v1112_v61 = vsub.f32 0.0, %v1048_v10  ;;  %2539 = vpow2.f32 %v1225_v16  ;;  %v976_v16 = vpop.f32.mrf.mxu1 }
 0x15d   : > { %v702_v26 = vpop.f32.mrf.mxu0  ;;  %2541 = vrcp.f32 %v1294_v12  ;;  %v2528_v34 = vpop.eup %2527  ;;  %v1483_v20 = vpack.c.bf16 %v1460_v13, %v1459_v62 }
 0x15e   : > { %v1050_v43 = vadd.f32 %v3241_v35, %v961_v60  ;;  %v3434_v33 = vadd.f32 %v964_v8, %v702_v26  ;;  %v1229_v1 = vmul.f32 1.442695, %v1112_v61  ;;  %v1296_v48 = vadd.f32 1.0, %v2528_v34  ;;  %v2530_v49 = vpop.eup %2529 }
 0x15f   : > { %v704_v4 = vpop.f32.mrf.mxu0  ;;  %2342 = vmatprep.mubr.bf16.mxu1 %v1483_v20 }
 0x160   : > { %v1114_v21 = vsub.f32 0.0, %v1050_v43  ;;  %2543 = vpow2.f32 %v1229_v1  ;;  %v967_v8 = vadd.f32 %v966_v3, %v704_v4  ;;  %v3445_v4 = vld [vmem:[%s2959_s12 + $0x90] sm:$0xff]  ;;  %v2770_v1 = vld [vmem:[%s2959_s12 + $0x98] sm:$0xff] }
 0x161   : > { %v706_v11 = vpop.f32.mrf.mxu0  ;;  %v2532_v0 = vpop.eup %2531 }
 0x162   : > { %v1233_v41 = vmul.f32 1.442695, %v1114_v21  ;;  %v3438_v46 = vadd.f32 %v968_v45, %v706_v11  ;;  %v2534_v51 = vpop.eup %2533  ;;  %v1052_v60 = vadd.f32 %v3241_v35, %v967_v8  ;;  %v978_v45 = vpop.f32.mrf.mxu1  ;;  %v1462_v25 = vmul.f32 %v2770_v1, %v2532_v0 }
 0x163   : > { %v708_v5 = vpop.f32.mrf.mxu0  ;;  %v1298_v26 = vadd.f32 1.0, %v2534_v51 }
 0x164   : > { %v971_v55 = vadd.f32 %v970_v9, %v708_v5  ;;  %2545 = vpow2.f32 %v1233_v41  ;;  %v1116_v3 = vsub.f32 0.0, %v1052_v60  ;;  %v1461_v9 = vmul.f32 %v3445_v4, %v2530_v49 }
 0x165   : > { %v712_v10 = vpop.f32.mrf.mxu0  ;;  %2547 = vrcp.f32 %v1296_v48  ;;  %v2536_v43 = vpop.eup %2535 }
 0x166   : > { %v1054_v53 = vadd.f32 %v3241_v35, %v971_v55  ;;  %v3442_v61 = vadd.f32 %v974_v22, %v712_v10  ;;  %2549 = vrcp.f32 %v1298_v26  ;;  %v1300_v40 = vadd.f32 1.0, %v2536_v43  ;;  %v2538_v11 = vpop.eup %2537  ;;  %v980_v48 = vpop.f32.mrf.mxu1  ;;  %v2771_v26 = vld [vmem:[%s2959_s12 + $0xa0] sm:$0xff] }
 0x167   : > { %v714_v12 = vpop.f32.mrf.mxu0  ;;  %v1237_v13 = vmul.f32 1.442695, %v1116_v3  ;;  %v1484_v34 = vpack.c.bf16 %v1462_v25, %v1461_v9  ;;  %v2772_v3 = vld [vmem:[%s2959_s12 + $0xa8] sm:$0xff] }
 0x168   : > { %v1118_v21 = vsub.f32 0.0, %v1054_v53  ;;  %2551 = vrcp.f32 %v1300_v40  ;;  %v977_v41 = vadd.f32 %v976_v16, %v714_v12  ;;  %v1463_v53 = vmul.f32 %v2771_v26, %v2538_v11 }
 0x169   : > { %v716_v62 = vpop.f32.mrf.mxu0  ;;  %v2540_v22 = vpop.eup %2539  ;;  %2553 = vpow2.f32 %v1237_v13  ;;  %2343 = vmatmul.mubr.bf16.gmra.mxu1 %v1484_v34  ;;  %v2774_v34 = vld [vmem:[%s2959_s12 + $0xb8] sm:$0xff] }
 0x16a   : > { %v3449_v5 = vadd.f32 %v978_v45, %v716_v62  ;;  %v1302_v8 = vadd.f32 1.0, %v2540_v22  ;;  %v2542_v55 = vpop.eup %2541  ;;  %v1241_v0 = vmul.f32 1.442695, %v1118_v21  ;;  %v1056_v10 = vadd.f32 %v3241_v35, %v977_v41  ;;  %v2773_v21 = vld [vmem:[%s2959_s12 + $0xb0] sm:$0xff] }
 0x16b   : > { %v718_v20 = vpop.f32.mrf.mxu0  ;;  %v1464_v43 = vmul.f32 %v2772_v3, %v2542_v55  ;;  %v2775_v55 = vld [vmem:[%s2959_s12 + $0xc0] sm:$0xff] }
 0x16c   : > { %v981_v49 = vadd.f32 %v980_v48, %v718_v20  ;;  %2555 = vrcp.f32 %v1302_v8  ;;  %v1120_v12 = vsub.f32 0.0, %v1056_v10  ;;  %v2776_v10 = vld [vmem:[%s2959_s12 + $0xc8] sm:$0xff] }
 0x16d   : > { %v2544_v51 = vpop.eup %2543  ;;  %v1485_v45 = vpack.c.bf16 %v1464_v43, %v1463_v53  ;;  %2557 = vpow2.f32 %v1241_v0 }
 0x16e   : > { %v1058_v60 = vadd.f32 %v3241_v35, %v981_v49  ;;  %v1304_v16 = vadd.f32 1.0, %v2544_v51  ;;  %v1245_v40 = vmul.f32 1.442695, %v1120_v12 }
 0x16f   : > { %2346 = vmatprep.mubr.bf16.mxu1 %v1485_v45  ;;  %v2778_v45 = vld [vmem:[%s2959_s12 + $0xd8] sm:$0xff] }
 0x170   : > { %v1122_v9 = vsub.f32 0.0, %v1058_v60  ;;  %2559 = vrcp.f32 %v1304_v16  ;;  %v2777_v16 = vld [vmem:[%s2959_s12 + $0xd0] sm:$0xff] }
 0x171   : > { %v2546_v1 = vpop.eup %2545 }
 0x172   : > { %v2548_v25 = vpop.eup %2547  ;;  %v1306_v62 = vadd.f32 1.0, %v2546_v1  ;;  %v1249_v35 = vmul.f32 1.442695, %v1122_v9 }
 0x173   : > { %v2550_v13 = vpop.eup %2549  ;;  %v1465_v11 = vmul.f32 %v2773_v21, %v2548_v25 }
 0x174   : > { %2561 = vrcp.f32 %v1306_v62  ;;  %v1466_v20 = vmul.f32 %v2774_v34, %v2550_v13 }
 0x175   : > { %2563 = vpow2.f32 %v1245_v40  ;;  %v2552_v22 = vpop.eup %2551 }
 0x176   : > { %v1486_v48 = vpack.c.bf16 %v1466_v20, %v1465_v11  ;;  %v2554_v41 = vpop.eup %2553  ;;  %2565 = vpow2.f32 %v1249_v35  ;;  %v1467_v0 = vmul.f32 %v2775_v55, %v2552_v22  ;;  %v2779_v11 = vld [vmem:[%s2959_s12 + $0xe0] sm:$0xff]  ;;  %v2780_v20 = vld [vmem:[%s2959_s12 + $0xe8] sm:$0xff] }
 0x177   : > { %v1308_v49 = vadd.f32 1.0, %v2554_v41 }
 0x178   : > { %2347 = vmatmul.mubr.bf16.gmra.mxu1 %v1486_v48 }
 0x179   : > { %v2556_v8 = vpop.eup %2555  ;;  %2567 = vrcp.f32 %v1308_v49  ;;  %v2781_v49 = vld [vmem:[%s2959_s12 + $0xf0] sm:$0xff] }
 0x17a   : > { %v1468_v51 = vmul.f32 %v2776_v10, %v2556_v8  ;;  %v2558_v26 = vpop.eup %2557 }
 0x17b   : > { %v1310_v3 = vadd.f32 1.0, %v2558_v26  ;;  %v995_v26 = vadd.f32 %v3121_v32, %v3238_v18  ;;  %v1007_v18 = vadd.f32 %v3121_v32, %v3258_v14 }
 0x17c   : > { %v1487_v60 = vpack.c.bf16 %v1468_v51, %v1467_v0  ;;  %v2782_v0 = vld [vmem:[%s2959_s12 + $0xf8] sm:$0xff] }
 0x17d   : > { %v2560_v53 = vpop.eup %2559  ;;  %2569 = vrcp.f32 %v1310_v3  ;;  %v1001_v3 = vadd.f32 %v3121_v32, %v3250_v37 }
 0x17e   : > { %2350 = vmatprep.mubr.bf16.mxu1 %v1487_v60  ;;  %v1469_v12 = vmul.f32 %v2777_v16, %v2560_v53  ;;  %v999_v60 = vadd.f32 %v3121_v32, %v3247_v15  ;;  %v997_v16 = vadd.f32 %v3121_v32, %v3244_v63  ;;  %v1003_v15 = vadd.f32 %v3121_v32, %v3253_v31 }
 0x17f   : > { %v1005_v63 = vadd.f32 %v3121_v32, %v3255_v58 }
 0x180   : > { %v1063_v53 = vsub.f32 0.0, %v999_v60  ;;  %v1067_v37 = vsub.f32 0.0, %v1003_v15 }
 0x181   : > { %v2562_v43 = vpop.eup %2561 }
 0x182   : > { %v1470_v9 = vmul.f32 %v2778_v45, %v2562_v43  ;;  %v2564_v1 = vpop.eup %2563  ;;  %v1059_v43 = vsub.f32 0.0, %v995_v26  ;;  %v1065_v45 = vsub.f32 0.0, %v1001_v3  ;;  %v1011_v26 = vadd.f32 %v3121_v32, %v3267_v7 }
 0x183   : > { %v1312_v25 = vadd.f32 1.0, %v2564_v1  ;;  %v2566_v40 = vpop.eup %2565 }
 0x184   : > { %v1488_v62 = vpack.c.bf16 %v1470_v9, %v1469_v12  ;;  %v1314_v13 = vadd.f32 1.0, %v2566_v40  ;;  %v1131_v12 = vmul.f32 1.442695, %v1063_v53  ;;  %v1061_v9 = vsub.f32 0.0, %v997_v16 }
 0x185   : > { %2571 = vrcp.f32 %v1312_v25  ;;  %v1071_v25 = vsub.f32 0.0, %v1007_v18  ;;  %v1139_v40 = vmul.f32 1.442695, %v1067_v37  ;;  %v1075_v7 = vsub.f32 0.0, %v1011_v26 }
 0x186   : > { %2351 = vmatmul.mubr.bf16.gmra.mxu1 %v1488_v62  ;;  %2573 = vrcp.f32 %v1314_v13  ;;  %v2568_v35 = vpop.eup %2567  ;;  %v1127_v1 = vmul.f32 1.442695, %v1061_v9  ;;  %v1009_v62 = vadd.f32 %v3121_v32, %v3261_v2  ;;  %v1069_v13 = vsub.f32 0.0, %v1005_v63 }
 0x187   : > { %v1471_v34 = vmul.f32 %v2779_v11, %v2568_v35  ;;  %2575 = vpow2.f32 %v1131_v12 }
 0x188   : > { %v1073_v11 = vsub.f32 0.0, %v1009_v62 }
 0x18a   : > { %v2570_v21 = vpop.eup %2569 }
 0x18b   : > { %v1472_v22 = vmul.f32 %v2780_v20, %v2570_v21  ;;  %v1147_v21 = vmul.f32 1.442695, %v1071_v25  ;;  %v1143_v20 = vmul.f32 1.442695, %v1069_v13 }
 0x18d   : > { %v1489_v48 = vpack.c.bf16 %v1472_v22, %v1471_v34  ;;  %v2364_v34 = vpop.f32.mrf.mxu0 }
 0x18f   : > { %2354 = vmatprep.mubr.bf16.mxu1 %v1489_v48  ;;  %v1151_v48 = vmul.f32 1.442695, %v1073_v11 }
 0x192   : > { %v2572_v41 = vpop.eup %2571 }
 0x193   : > { %v2574_v8 = vpop.eup %2573  ;;  %v1473_v55 = vmul.f32 %v2781_v49, %v2572_v41 }
 0x194   : > { %v1474_v10 = vmul.f32 %v2782_v0, %v2574_v8  ;;  %v2576_v35 = vpop.eup %2575  ;;  %v1766_v8 = vpop.f32.mrf.mxu0 }
 0x195   : > { %v1255_v22 = vadd.f32 1.0, %v2576_v35 }
 0x196   : > { %v1490_v51 = vpack.c.bf16 %v1474_v10, %v1473_v55  ;;  %v1015_v55 = vadd.f32 %v3121_v32, %v3279_v44  ;;  %v3490_v10 = vld [vmem:[%s3649_s7] ss:$0 sm:$0xff]  ;;  %v1017_v44 = vadd.f32 %v3121_v32, %v3285_v39 }
 0x198   : > { %2355 = vmatmul.mubr.bf16.gmra.mxu1 %v1490_v51  ;;  %v2365_v51 = vpop.f32.mrf.mxu0  ;;  %v1079_v16 = vsub.f32 0.0, %v1015_v55  ;;  %v1081_v62 = vsub.f32 0.0, %v1017_v44  ;;  %v1023_v55 = vadd.f32 %v3121_v32, %v3317_v30  ;;  %v2783_v44 = vld [vmem:[%s2959_s12 + $0x10] sm:$0xff] }
 0x199   : > { %2390 = vmatprep.mubr.msk.bf16.mxu1 %vm741_vm0, %v3153_v6  ;;  %v1123_v6 = vmul.f32 1.442695, %v1059_v43 }
 0x19a   : > { %v1163_v25 = vmul.f32 1.442695, %v1079_v16  ;;  %v1021_v16 = vadd.f32 %v3121_v32, %v3303_v27  ;;  %v1025_v27 = vadd.f32 %v3121_v32, %v3323_v56 }
 0x19b   : > { %2577 = vpow2.f32 %v1123_v6  ;;  %v1013_v6 = vadd.f32 %v3121_v32, %v3271_v28 }
 0x1a0   : > { %2391 = vmatmul.mubr.msk.bf16.vlgmr.msra.gmra.mxu1 %vm741_vm0, %v3169_v19  ;;  %v1135_v19 = vmul.f32 1.442695, %v1065_v45  ;;  %v1769_v45 = vpop.f32.mrf.mxu0 }
 0x1a2   : > { %2579 = vpow2.f32 %v1135_v19  ;;  %v2368_v28 = vpop.f32.mrf.mxu0 }
 0x1a3   : > { %2581 = vpow2.f32 %v1127_v1 }
 0x1a4   : > { %2583 = vpow2.f32 %v1139_v40  ;;  %v1077_v40 = vsub.f32 0.0, %v1013_v6 }
 0x1a5   : > { %2585 = vpow2.f32 %v1147_v21  ;;  %v1155_v21 = vmul.f32 1.442695, %v1075_v7 }
 0x1a6   : > { %2587 = vpow2.f32 %v1143_v20  ;;  %v1167_v20 = vmul.f32 1.442695, %v1081_v62 }
 0x1a7   : > { %2589 = vrcp.f32 %v1255_v22 }
 0x1a8   : > { %v2578_v31 = vpop.eup %2577  ;;  %2591 = vpow2.f32 %v1151_v48  ;;  %v1782_v48 = vpop.f32.mrf.mxu0 }
 0x1a9   : > { %v1251_v41 = vadd.f32 1.0, %v2578_v31 }
 0x1ab   : > { %2593 = vrcp.f32 %v1251_v41 }
 0x1af   : > { %v2580_v14 = vpop.eup %2579 }
 0x1b0   : > { %v2582_v58 = vpop.eup %2581  ;;  %v1257_v49 = vadd.f32 1.0, %v2580_v14  ;;  %v1159_v14 = vmul.f32 1.442695, %v1077_v40 }
 0x1b1   : > { %v1253_v2 = vadd.f32 1.0, %v2582_v58  ;;  %v2584_v1 = vpop.eup %2583 }
 0x1b2   : > { %2595 = vrcp.f32 %v1257_v49  ;;  %v2586_v63 = vpop.eup %2585  ;;  %v1259_v39 = vadd.f32 1.0, %v2584_v1 }
 0x1b3   : > { %2597 = vrcp.f32 %v1253_v2  ;;  %v2588_v35 = vpop.eup %2587 }
 0x1b4   : > { %v2590_v11 = vpop.eup %2589  ;;  %v1261_v41 = vadd.f32 1.0, %v2588_v35 }
 0x1b5   : > { %v2592_v31 = vpop.eup %2591  ;;  %v1966_v58 = vsub.f32 1.0, %v2590_v11 }
 0x1b6   : > { %v1265_v49 = vadd.f32 1.0, %v2592_v31 }
 0x1b8   : > { %v2594_v22 = vpop.eup %2593 }
 0x1b9   : > { %v1964_v2 = vsub.f32 1.0, %v2594_v22 }
 0x1e6   : > { %v2328_v0 = vpop.f32.mrf.mxu1 }
 0x1e7   : > { %v1775_v60 = vadd.f32 %v2364_v34, %v2328_v0  ;;  %v1263_v34 = vadd.f32 1.0, %v2586_v63 }
 0x1e8   : > { %v1593_v53 = vpop.f32.mrf.mxu1 }
 0x1e9   : > { %v1902_v3 = vadd.f32 %v3490_v10, %v1775_v60  ;;  %v1767_v43 = vadd.f32 %v1766_v8, %v1593_v53  ;;  %v2596_v8 = vpop.eup %2595  ;;  %v2369_v60 = vpop.f32.mrf.mxu0 }
 0x1ea   : > { %v2329_v12 = vpop.f32.mrf.mxu1  ;;  %v2598_v0 = vpop.eup %2597  ;;  %v1967_v53 = vsub.f32 1.0, %v2596_v8 }
 0x1eb   : > { %2599 = vtanh.f32 %v1902_v3  ;;  %v1900_v9 = vadd.f32 %v3490_v10, %v1767_v43  ;;  %v1778_v19 = vadd.f32 %v2365_v51, %v2329_v12  ;;  %v1019_v3 = vadd.f32 %v3121_v32, %v3295_v52 }
 0x1ec   : > { %v1596_v15 = vpop.f32.mrf.mxu1  ;;  %v1998_v12 = vmul.f32 %v2783_v44, %v1966_v58 }
 0x1ed   : > { %2601 = vtanh.f32 %v1900_v9  ;;  %v1903_v18 = vadd.f32 %v3490_v10, %v1778_v19  ;;  %v1770_v37 = vadd.f32 %v1769_v45, %v1596_v15  ;;  %v1087_v9 = vsub.f32 0.0, %v1023_v55  ;;  %v2784_v19 = vld [vmem:[%s2959_s12] sm:$0xff] }
 0x1ee   : > { %v1996_v1 = vmul.f32 %v2784_v19, %v1964_v2  ;;  %v1965_v15 = vsub.f32 1.0, %v2598_v0 }
 0x1ef   : > { %2603 = vtanh.f32 %v1903_v18  ;;  %v1901_v13 = vadd.f32 %v3490_v10, %v1770_v37 }
 0x1f1   : > { %2605 = vtanh.f32 %v1901_v13 }
 0x1f2   : > { %2607 = vpow2.f32 %v1163_v25  ;;  %v1785_v25 = vpop.f32.mrf.mxu0 }
 0x1f3   : > { %2609 = vrcp.f32 %v1259_v39  ;;  %v1083_v39 = vsub.f32 0.0, %v1019_v3 }
 0x1f4   : > { %2611 = vpow2.f32 %v1155_v21  ;;  %v2785_v21 = vld [vmem:[%s2959_s12 + $0x18] sm:$0xff] }
 0x1f5   : > { %2613 = vrcp.f32 %v1263_v34 }
 0x1f6   : > { %2615 = vpow2.f32 %v1167_v20  ;;  %v1179_v20 = vmul.f32 1.442695, %v1087_v9 }
 0x1f7   : > { %2617 = vpow2.f32 %v1159_v14  ;;  %v2332_v51 = vpop.f32.mrf.mxu1 }
 0x1f8   : > { %v2600_v26 = vpop.eup %2599  ;;  %2619 = vrcp.f32 %v1261_v41  ;;  %v1791_v43 = vadd.f32 %v2368_v28, %v2332_v51  ;;  %v1085_v28 = vsub.f32 0.0, %v1021_v16  ;;  %v1089_v41 = vsub.f32 0.0, %v1025_v27 }
 0x1f9   : > { %2621 = vrcp.f32 %v1265_v49  ;;  %v2030_v30 = vmul.f32 %v2600_v26, %v2590_v11  ;;  %v1609_v45 = vpop.f32.mrf.mxu1  ;;  %v1999_v11 = vmul.f32 %v2785_v21, %v1967_v53  ;;  %v2786_v49 = vld [vmem:[%s2959_s12 + $0x8] sm:$0xff]  ;;  %v2372_v26 = vpop.f32.mrf.mxu0 }
 0x1fa   : > { %v2602_v6 = vpop.eup %2601  ;;  %v1906_v52 = vadd.f32 %v3490_v10, %v1791_v43  ;;  %v1783_v7 = vadd.f32 %v1782_v48, %v1609_v45  ;;  %v1997_v2 = vmul.f32 %v2786_v49, %v1965_v15  ;;  %v1175_v3 = vmul.f32 1.442695, %v1085_v28  ;;  %v2787_v28 = vld [vmem:[%s2959_s12 + $0x30] sm:$0xff] }
 0x1fb   : > { %v2062_v18 = vadd.f32 %v2030_v30, %v1998_v12  ;;  %v2028_v37 = vmul.f32 %v2602_v6, %v2594_v22  ;;  %v2333_v63 = vpop.f32.mrf.mxu1  ;;  %v1183_v30 = vmul.f32 1.442695, %v1089_v41  ;;  %v1798_v6 = vpop.f32.mrf.mxu0  ;;  %v1031_v15 = vadd.f32 %v3121_v32, %v3360_v59 }
 0x1fc   : > { %v2604_v62 = vpop.eup %2603  ;;  %2623 = vtanh.f32 %v1906_v52  ;;  %v1904_v40 = vadd.f32 %v3490_v10, %v1783_v7  ;;  %v1794_v13 = vadd.f32 %v2369_v60, %v2333_v63  ;;  %v1171_v60 = vmul.f32 1.442695, %v1083_v39 }
 0x1fd   : > { %2094 = vst [vmem:[%s3513_s23 + $0x10] sm:$0xff] %v2062_v18  ;;  %v2060_v35 = vadd.f32 %v2028_v37, %v1996_v1  ;;  %v2031_v34 = vmul.f32 %v2604_v62, %v2596_v8  ;;  %v1612_v31 = vpop.f32.mrf.mxu1  ;;  %v2373_v37 = vpop.f32.mrf.mxu0  ;;  %v1027_v39 = vadd.f32 %v3121_v32, %v3335_v24  ;;  %v1033_v24 = vadd.f32 %v3121_v32, %v3368_v23 }
 0x1fe   : > { %v2606_v56 = vpop.eup %2605  ;;  %2625 = vtanh.f32 %v1904_v40  ;;  %v1907_v22 = vadd.f32 %v3490_v10, %v1794_v13  ;;  %v1786_v14 = vadd.f32 %v1785_v25, %v1612_v31  ;;  %v1029_v13 = vadd.f32 %v3121_v32, %v3348_v42 }
 0x1ff   : > { %v2608_v48 = vpop.eup %2607  ;;  %2092 = vst [vmem:[%s3513_s23] sm:$0xff] %v2060_v35  ;;  %v2063_v58 = vadd.f32 %v2031_v34, %v1999_v11  ;;  %v2029_v55 = vmul.f32 %v2606_v56, %v2598_v0  ;;  %v1095_v34 = vsub.f32 0.0, %v1031_v15  ;;  %v1801_v41 = vpop.f32.mrf.mxu0  ;;  %v1091_v49 = vsub.f32 0.0, %v1027_v39 }
 0x200   : > { %v2610_v51 = vpop.eup %2609  ;;  %2627 = vtanh.f32 %v1907_v22  ;;  %v1905_v8 = vadd.f32 %v3490_v10, %v1786_v14  ;;  %v1271_v44 = vadd.f32 1.0, %v2608_v48  ;;  %v2788_v22 = vld [vmem:[%s2959_s12 + $0x20] sm:$0xff] }
 0x201   : > { %v2612_v53 = vpop.eup %2611  ;;  %2095 = vst [vmem:[%s3513_s23 + $0x18] sm:$0xff] %v2063_v58  ;;  %v2061_v43 = vadd.f32 %v2029_v55, %v1997_v2  ;;  %v1968_v27 = vsub.f32 1.0, %v2610_v51  ;;  %v2376_v15 = vpop.f32.mrf.mxu0 }
 0x202   : > { %v2614_v16 = vpop.eup %2613  ;;  %2629 = vtanh.f32 %v1905_v8  ;;  %v1267_v0 = vadd.f32 1.0, %v2612_v53 }
 0x203   : > { %v2616_v12 = vpop.eup %2615  ;;  %2631 = vpow2.f32 %v1179_v20  ;;  %2093 = vst [vmem:[%s3513_s23 + $0x8] sm:$0xff] %v2061_v43  ;;  %v1970_v1 = vsub.f32 1.0, %v2614_v16  ;;  %v2000_v14 = vmul.f32 %v2788_v22, %v1968_v27 }
 0x204   : > { %v2618_v45 = vpop.eup %2617  ;;  %2633 = vpow2.f32 %v1171_v60  ;;  %v1273_v52 = vadd.f32 1.0, %v2616_v12  ;;  %v1093_v60 = vsub.f32 0.0, %v1029_v13  ;;  %v1814_v13 = vpop.f32.mrf.mxu0 }
 0x205   : > { %v2620_v9 = vpop.eup %2619  ;;  %2635 = vpow2.f32 %v1175_v3  ;;  %v1269_v7 = vadd.f32 1.0, %v2618_v45  ;;  %v2002_v35 = vmul.f32 %v2787_v28, %v1970_v1 }
 0x206   : > { %v2622_v19 = vpop.eup %2621  ;;  %2637 = vrcp.f32 %v1271_v44  ;;  %v1969_v25 = vsub.f32 1.0, %v2620_v9 }
 0x207   : > { %2639 = vpow2.f32 %v1183_v30  ;;  %v1971_v62 = vsub.f32 1.0, %v2622_v19  ;;  %v1097_v30 = vsub.f32 0.0, %v1033_v24 }
 0x208   : > { %2641 = vrcp.f32 %v1267_v0  ;;  %v2336_v18 = vpop.f32.mrf.mxu1  ;;  %v2790_v0 = vld [vmem:[%s2959_s12 + $0x28] sm:$0xff] }
 0x209   : > { %v2624_v63 = vpop.eup %2623  ;;  %v1807_v40 = vadd.f32 %v2372_v26, %v2336_v18  ;;  %2643 = vrcp.f32 %v1273_v52  ;;  %v2789_v26 = vld [vmem:[%s2959_s12 + $0x38] sm:$0xff]  ;;  %v1191_v18 = vmul.f32 1.442695, %v1093_v60 }
 0x20a   : > { %v2034_v21 = vmul.f32 %v2624_v63, %v2614_v16  ;;  %v1625_v59 = vpop.f32.mrf.mxu1  ;;  %2645 = vrcp.f32 %v1269_v7  ;;  %v2003_v53 = vmul.f32 %v2789_v26, %v1971_v62  ;;  %v1195_v16 = vmul.f32 1.442695, %v1095_v34 }
 0x20b   : > { %v2626_v11 = vpop.eup %2625  ;;  %v1910_v31 = vadd.f32 %v3490_v10, %v1807_v40  ;;  %v1799_v56 = vadd.f32 %v1798_v6, %v1625_v59  ;;  %v2001_v6 = vmul.f32 %v2790_v0, %v1969_v25  ;;  %v1187_v7 = vmul.f32 1.442695, %v1091_v49 }
 0x20c   : > { %v2066_v20 = vadd.f32 %v2034_v21, %v2002_v35  ;;  %v2032_v48 = vmul.f32 %v2626_v11, %v2610_v51  ;;  %v2337_v42 = vpop.f32.mrf.mxu1  ;;  %v1199_v40 = vmul.f32 1.442695, %v1097_v30  ;;  %v1039_v35 = vadd.f32 %v3121_v32, %v3398_v29 }
 0x20d   : > { %v2628_v58 = vpop.eup %2627  ;;  %2647 = vtanh.f32 %v1910_v31  ;;  %v1908_v2 = vadd.f32 %v3490_v10, %v1799_v56  ;;  %v1810_v55 = vadd.f32 %v2373_v37, %v2337_v42  ;;  %v1035_v31 = vadd.f32 %v3121_v32, %v3380_v36 }
 0x20e   : > { %2098 = vst [vmem:[%s3513_s23 + $0x30] sm:$0xff] %v2066_v20  ;;  %v2064_v8 = vadd.f32 %v2032_v48, %v2000_v14  ;;  %v2035_v23 = vmul.f32 %v2628_v58, %v2622_v19  ;;  %v1628_v3 = vpop.f32.mrf.mxu1  ;;  %v2377_v20 = vpop.f32.mrf.mxu0  ;;  %v1103_v48 = vsub.f32 0.0, %v1039_v35  ;;  %v1041_v42 = vadd.f32 %v3121_v32, %v3406_v38 }
 0x20f   : > { %v2630_v43 = vpop.eup %2629  ;;  %2649 = vtanh.f32 %v1908_v2  ;;  %v1911_v51 = vadd.f32 %v3490_v10, %v1810_v55  ;;  %v1802_v44 = vadd.f32 %v1801_v41, %v1628_v3  ;;  %v2791_v41 = vld [vmem:[%s2959_s12 + $0x50] sm:$0xff]  ;;  %v1099_v60 = vsub.f32 0.0, %v1035_v31  ;;  %v2792_v3 = vld [vmem:[%s2959_s12 + $0x40] sm:$0xff] }
 0x210   : > { %v2632_v12 = vpop.eup %2631  ;;  %2096 = vst [vmem:[%s3513_s23 + $0x20] sm:$0xff] %v2064_v8  ;;  %v2067_v45 = vadd.f32 %v2035_v23, %v2003_v53  ;;  %v2033_v1 = vmul.f32 %v2630_v43, %v2620_v9  ;;  %v1037_v53 = vadd.f32 %v3121_v32, %v3388_v17  ;;  %v1105_v0 = vsub.f32 0.0, %v1041_v42 }
 0x211   : > { %v2634_v52 = vpop.eup %2633  ;;  %2651 = vtanh.f32 %v1911_v51  ;;  %v1909_v19 = vadd.f32 %v3490_v10, %v1802_v44  ;;  %v1279_v62 = vadd.f32 1.0, %v2632_v12  ;;  %v1817_v51 = vpop.f32.mrf.mxu0  ;;  %v1211_v12 = vmul.f32 1.442695, %v1103_v48 }
 0x212   : > { %v2636_v27 = vpop.eup %2635  ;;  %2099 = vst [vmem:[%s3513_s23 + $0x38] sm:$0xff] %v2067_v45  ;;  %v2065_v37 = vadd.f32 %v2033_v1, %v2001_v6  ;;  %v1275_v9 = vadd.f32 1.0, %v2634_v52  ;;  %v2793_v1 = vld [vmem:[%s2959_s12 + $0x58] sm:$0xff]  ;;  %v1047_v35 = vadd.f32 %v3121_v32, %v3423_v50 }
 0x213   : > { %v2638_v63 = vpop.eup %2637  ;;  %2653 = vtanh.f32 %v1909_v19  ;;  %v1277_v28 = vadd.f32 1.0, %v2636_v27 }
 0x214   : > { %v2640_v39 = vpop.eup %2639  ;;  %2655 = vpow2.f32 %v1195_v16  ;;  %2097 = vst [vmem:[%s3513_s23 + $0x28] sm:$0xff] %v2065_v37  ;;  %v1974_v59 = vsub.f32 1.0, %v2638_v63 }
 0x215   : > { %v2642_v25 = vpop.eup %2641  ;;  %2657 = vpow2.f32 %v1187_v7  ;;  %v1281_v11 = vadd.f32 1.0, %v2640_v39  ;;  %v2794_v39 = vld [vmem:[%s2959_s12 + $0x48] sm:$0xff] }
 0x216   : > { %2659 = vpow2.f32 %v1191_v18  ;;  %v2644_v21 = vpop.eup %2643  ;;  %v1972_v56 = vsub.f32 1.0, %v2642_v25  ;;  %v2006_v58 = vmul.f32 %v2791_v41, %v1974_v59 }
 0x217   : > { %2661 = vrcp.f32 %v1279_v62  ;;  %v2646_v34 = vpop.eup %2645  ;;  %v1975_v14 = vsub.f32 1.0, %v2644_v21 }
 0x218   : > { %2663 = vpow2.f32 %v1199_v40  ;;  %v1973_v36 = vsub.f32 1.0, %v2646_v34  ;;  %v2004_v43 = vmul.f32 %v2792_v3, %v1972_v56 }
 0x219   : > { %2665 = vrcp.f32 %v1275_v9  ;;  %v2340_v24 = vpop.f32.mrf.mxu1  ;;  %v2007_v52 = vmul.f32 %v2793_v1, %v1975_v14  ;;  %v2380_v9 = vpop.f32.mrf.mxu0 }
 0x21a   : > { %v2648_v22 = vpop.eup %2647  ;;  %2667 = vrcp.f32 %v1277_v28  ;;  %v1823_v29 = vadd.f32 %v2376_v15, %v2340_v24  ;;  %v1203_v15 = vmul.f32 1.442695, %v1099_v60  ;;  %v2005_v40 = vmul.f32 %v2794_v39, %v1973_v36 }
 0x21b   : > { %2669 = vrcp.f32 %v1281_v11  ;;  %v2038_v49 = vmul.f32 %v2648_v22, %v2638_v63  ;;  %v1641_v2 = vpop.f32.mrf.mxu1  ;;  %v1043_v63 = vadd.f32 %v3121_v32, %v3412_v57  ;;  %v1101_v28 = vsub.f32 0.0, %v1037_v53  ;;  %v1830_v50 = vpop.f32.mrf.mxu0 }
 0x21c   : > { %v2650_v55 = vpop.eup %2649  ;;  %v1914_v8 = vadd.f32 %v3490_v10, %v1823_v29  ;;  %v1815_v26 = vadd.f32 %v1814_v13, %v1641_v2  ;;  %v1215_v11 = vmul.f32 1.442695, %v1105_v0  ;;  %v1045_v22 = vadd.f32 %v3121_v32, %v3419_v47 }
 0x21d   : > { %v2070_v23 = vadd.f32 %v2038_v49, %v2006_v58  ;;  %v2036_v16 = vmul.f32 %v2650_v55, %v2642_v25  ;;  %v2341_v38 = vpop.f32.mrf.mxu1  ;;  %v1207_v48 = vmul.f32 1.442695, %v1101_v28  ;;  %v1111_v29 = vsub.f32 0.0, %v1047_v35  ;;  %v2381_v47 = vpop.f32.mrf.mxu0 }
 0x21e   : > { %v2652_v44 = vpop.eup %2651  ;;  %2671 = vtanh.f32 %v1914_v8  ;;  %v1912_v30 = vadd.f32 %v3490_v10, %v1815_v26  ;;  %v1826_v45 = vadd.f32 %v2377_v20, %v2341_v38  ;;  %v1107_v20 = vsub.f32 0.0, %v1043_v63 }
 0x21f   : > { %2102 = vst [vmem:[%s3513_s23 + $0x50] sm:$0xff] %v2070_v23  ;;  %v2068_v6 = vadd.f32 %v2036_v16, %v2004_v43  ;;  %v2039_v17 = vmul.f32 %v2652_v44, %v2644_v21  ;;  %v1644_v7 = vpop.f32.mrf.mxu1  ;;  %v1049_v55 = vadd.f32 %v3121_v32, %v3431_v54  ;;  %v1109_v60 = vsub.f32 0.0, %v1045_v22  ;;  %v1833_v1 = vpop.f32.mrf.mxu0 }
 0x220   : > { %v2654_v19 = vpop.eup %2653  ;;  %2673 = vtanh.f32 %v1912_v30  ;;  %v1915_v27 = vadd.f32 %v3490_v10, %v1826_v45  ;;  %v1818_v18 = vadd.f32 %v1817_v51, %v1644_v7  ;;  %v1219_v36 = vmul.f32 1.442695, %v1107_v20  ;;  %v2795_v51 = vld [vmem:[%s2959_s12 + $0x70] sm:$0xff] }
 0x221   : > { %v2656_v37 = vpop.eup %2655  ;;  %2100 = vst [vmem:[%s3513_s23 + $0x40] sm:$0xff] %v2068_v6  ;;  %v2071_v62 = vadd.f32 %v2039_v17, %v2007_v52  ;;  %v2037_v25 = vmul.f32 %v2654_v19, %v2646_v34  ;;  %v1227_v26 = vmul.f32 1.442695, %v1111_v29  ;;  %v1113_v38 = vsub.f32 0.0, %v1049_v55  ;;  %v2796_v17 = vld [vmem:[%s2959_s12 + $0x60] sm:$0xff]  ;;  %v2384_v63 = vpop.f32.mrf.mxu0 }
 0x222   : > { %v2658_v13 = vpop.eup %2657  ;;  %2675 = vtanh.f32 %v1915_v27  ;;  %v1913_v21 = vadd.f32 %v3490_v10, %v1818_v18  ;;  %v1287_v56 = vadd.f32 1.0, %v2656_v37  ;;  %v1223_v45 = vmul.f32 1.442695, %v1109_v60 }
 0x223   : > { %v2660_v59 = vpop.eup %2659  ;;  %2677 = vpow2.f32 %v1211_v12  ;;  %2103 = vst [vmem:[%s3513_s23 + $0x58] sm:$0xff] %v2071_v62  ;;  %v2069_v57 = vadd.f32 %v2037_v25, %v2005_v40  ;;  %v1283_v34 = vadd.f32 1.0, %v2658_v13  ;;  %v1231_v39 = vmul.f32 1.442695, %v1113_v38  ;;  %v2797_v25 = vld [vmem:[%s2959_s12 + $0x78] sm:$0xff]  ;;  %v1846_v22 = vpop.f32.mrf.mxu0 }
 0x224   : > { %v2662_v31 = vpop.eup %2661  ;;  %2679 = vtanh.f32 %v1913_v21  ;;  %v1285_v41 = vadd.f32 1.0, %v2660_v59 }
 0x225   : > { %v2664_v24 = vpop.eup %2663  ;;  %2681 = vpow2.f32 %v1203_v15  ;;  %2101 = vst [vmem:[%s3513_s23 + $0x48] sm:$0xff] %v2069_v57  ;;  %v1978_v49 = vsub.f32 1.0, %v2662_v31 }
 0x226   : > { %v2666_v14 = vpop.eup %2665  ;;  %2683 = vpow2.f32 %v1215_v11  ;;  %v1289_v2 = vadd.f32 1.0, %v2664_v24 }
 0x227   : > { %v2668_v42 = vpop.eup %2667  ;;  %2685 = vrcp.f32 %v1287_v56  ;;  %v1976_v8 = vsub.f32 1.0, %v2666_v14  ;;  %v2010_v44 = vmul.f32 %v2795_v51, %v1978_v49 }
 0x228   : > { %v2670_v58 = vpop.eup %2669  ;;  %2687 = vrcp.f32 %v1283_v34  ;;  %v1977_v3 = vsub.f32 1.0, %v2668_v42 }
 0x229   : > { %2689 = vpow2.f32 %v1207_v48  ;;  %v2344_v53 = vpop.f32.mrf.mxu1  ;;  %v1979_v43 = vsub.f32 1.0, %v2670_v58  ;;  %v2008_v7 = vmul.f32 %v2796_v17, %v1976_v8 }
 0x22a   : > { %2691 = vrcp.f32 %v1285_v41  ;;  %v1839_v16 = vadd.f32 %v2380_v9, %v2344_v53 }
 0x22b   : > { %v2672_v23 = vpop.eup %2671  ;;  %2693 = vrcp.f32 %v1289_v2  ;;  %v1657_v12 = vpop.f32.mrf.mxu1  ;;  %v2011_v9 = vmul.f32 %v2797_v25, %v1979_v43 }
 0x22c   : > { %v2042_v54 = vmul.f32 %v2672_v23, %v2662_v31  ;;  %2695 = vpow2.f32 %v1219_v36  ;;  %v1918_v0 = vadd.f32 %v3490_v10, %v1839_v16  ;;  %v1831_v6 = vadd.f32 %v1830_v50, %v1657_v12  ;;  %v2798_v31 = vld [vmem:[%s2959_s12 + $0x68] sm:$0xff]  ;;  %v2385_v2 = vpop.f32.mrf.mxu0 }
 0x22d   : > { %v2674_v30 = vpop.eup %2673  ;;  %2697 = vpow2.f32 %v1227_v26  ;;  %v2345_v15 = vpop.f32.mrf.mxu1  ;;  %v2009_v56 = vmul.f32 %v2798_v31, %v1977_v3  ;;  %v1051_v36 = vadd.f32 %v3121_v32, %v3434_v33  ;;  %v1057_v31 = vadd.f32 %v3121_v32, %v3449_v5 }
 0x22e   : > { %v2074_v52 = vadd.f32 %v2042_v54, %v2010_v44  ;;  %v2040_v19 = vmul.f32 %v2674_v30, %v2666_v14  ;;  %2699 = vtanh.f32 %v1918_v0  ;;  %v1916_v18 = vadd.f32 %v3490_v10, %v1831_v6  ;;  %v1849_v51 = vpop.f32.mrf.mxu0 }
 0x22f   : > { %v2676_v27 = vpop.eup %2675  ;;  %v1842_v37 = vadd.f32 %v2381_v47, %v2345_v15  ;;  %v1660_v28 = vpop.f32.mrf.mxu1  ;;  %v1115_v30 = vsub.f32 0.0, %v1051_v36  ;;  %v2799_v15 = vld [vmem:[%s2959_s12 + $0x80] sm:$0xff] }
 0x230   : > { %v2678_v62 = vpop.eup %2677  ;;  %2106 = vst [vmem:[%s3513_s23 + $0x70] sm:$0xff] %v2074_v52  ;;  %v2072_v40 = vadd.f32 %v2040_v19, %v2008_v7  ;;  %v2043_v13 = vmul.f32 %v2676_v27, %v2670_v58  ;;  %2701 = vtanh.f32 %v1916_v18  ;;  %v1834_v59 = vadd.f32 %v1833_v1, %v1660_v28  ;;  %v2388_v52 = vpop.f32.mrf.mxu0  ;;  %v2800_v28 = vld [vmem:[%s2959_s12 + $0x98] sm:$0xff] }
 0x231   : > { %v2680_v35 = vpop.eup %2679  ;;  %v1919_v21 = vadd.f32 %v3490_v10, %v1842_v37  ;;  %2703 = vpow2.f32 %v1223_v45  ;;  %v1295_v34 = vadd.f32 1.0, %v2678_v62  ;;  %v1055_v19 = vadd.f32 %v3121_v32, %v3442_v61 }
 0x232   : > { %v2682_v11 = vpop.eup %2681  ;;  %2104 = vst [vmem:[%s3513_s23 + $0x60] sm:$0xff] %v2072_v40  ;;  %v2075_v57 = vadd.f32 %v2043_v13, %v2011_v9  ;;  %v2041_v24 = vmul.f32 %v2680_v35, %v2668_v42  ;;  %v1917_v20 = vadd.f32 %v3490_v10, %v1834_v59  ;;  %v1235_v40 = vmul.f32 1.442695, %v1115_v30 }
 0x233   : > { %2705 = vtanh.f32 %v1919_v21  ;;  %v2684_v50 = vpop.eup %2683  ;;  %v1291_v29 = vadd.f32 1.0, %v2682_v11  ;;  %v1862_v21 = vpop.f32.mrf.mxu0 }
 0x234   : > { %2707 = vpow2.f32 %v1231_v39  ;;  %2107 = vst [vmem:[%s3513_s23 + $0x78] sm:$0xff] %v2075_v57  ;;  %v2073_v14 = vadd.f32 %v2041_v24, %v2009_v56  ;;  %v2686_v48 = vpop.eup %2685  ;;  %v1297_v49 = vadd.f32 1.0, %v2684_v50  ;;  %v1119_v57 = vsub.f32 0.0, %v1055_v19 }
 0x235   : > { %2709 = vtanh.f32 %v1917_v20  ;;  %v2688_v41 = vpop.eup %2687  ;;  %v1982_v42 = vsub.f32 1.0, %v2686_v48  ;;  %v2389_v5 = vpop.f32.mrf.mxu0 }
 0x236   : > { %2105 = vst [vmem:[%s3513_s23 + $0x68] sm:$0xff] %v2073_v14  ;;  %v2690_v58 = vpop.eup %2689  ;;  %2711 = vrcp.f32 %v1295_v34  ;;  %v1980_v53 = vsub.f32 1.0, %v2688_v41  ;;  %v2801_v34 = vld [vmem:[%s2959_s12 + $0x88] sm:$0xff] }
 0x237   : > { %v2692_v55 = vpop.eup %2691  ;;  %2713 = vrcp.f32 %v1291_v29  ;;  %v1293_v23 = vadd.f32 1.0, %v2690_v58  ;;  %v2014_v33 = vmul.f32 %v3445_v4, %v1982_v42  ;;  %v1053_v29 = vadd.f32 %v3121_v32, %v3438_v46 }
 0x238   : > { %v2348_v60 = vpop.f32.mrf.mxu1  ;;  %v2694_v47 = vpop.eup %2693  ;;  %2715 = vrcp.f32 %v1297_v49  ;;  %v1981_v54 = vsub.f32 1.0, %v2692_v55  ;;  %v2012_v27 = vmul.f32 %v2799_v15, %v1980_v53 }
 0x239   : > { %v1855_v8 = vadd.f32 %v2384_v63, %v2348_v60  ;;  %v2696_v26 = vpop.eup %2695  ;;  %v1983_v12 = vsub.f32 1.0, %v2694_v47  ;;  %v1243_v60 = vmul.f32 1.442695, %v1119_v57  ;;  %v1117_v46 = vsub.f32 0.0, %v1053_v29 }
 0x23a   : > { %v1673_v3 = vpop.f32.mrf.mxu1  ;;  %v2698_v43 = vpop.eup %2697  ;;  %v1299_v11 = vadd.f32 1.0, %v2696_v26  ;;  %v2013_v20 = vmul.f32 %v2801_v34, %v1981_v54  ;;  %v2802_v54 = vld [vmem:[%s2959_s12 + $0xb0] sm:$0xff] }
 0x23b   : > { %v1922_v16 = vadd.f32 %v3490_v10, %v1855_v8  ;;  %v1847_v38 = vadd.f32 %v1846_v22, %v1673_v3  ;;  %v2700_v44 = vpop.eup %2699  ;;  %v1303_v7 = vadd.f32 1.0, %v2698_v43  ;;  %v2015_v35 = vmul.f32 %v2800_v28, %v1983_v12  ;;  %v2806_v34 = vld [vmem:[%s2959_s12 + $0xd0] sm:$0xff] }
 0x23c   : > { %v2349_v45 = vpop.f32.mrf.mxu1  ;;  %v2046_v0 = vmul.f32 %v2700_v44, %v2686_v48 }
 0x23d   : > { %2717 = vtanh.f32 %v1922_v16  ;;  %v1920_v6 = vadd.f32 %v3490_v10, %v1847_v38  ;;  %v1858_v1 = vadd.f32 %v2385_v2, %v2349_v45  ;;  %v2702_v17 = vpop.eup %2701  ;;  %v1121_v2 = vsub.f32 0.0, %v1057_v31 }
 0x23e   : > { %2719 = vrcp.f32 %v1293_v23  ;;  %v1676_v18 = vpop.f32.mrf.mxu1  ;;  %v2704_v37 = vpop.eup %2703  ;;  %v2078_v4 = vadd.f32 %v2046_v0, %v2014_v33  ;;  %v2044_v63 = vmul.f32 %v2702_v17, %v2688_v41  ;;  %v2803_v17 = vld [vmem:[%s2959_s12 + $0xa0] sm:$0xff] }
 0x23f   : > { %2721 = vtanh.f32 %v1920_v6  ;;  %v1923_v62 = vadd.f32 %v3490_v10, %v1858_v1  ;;  %v1850_v25 = vadd.f32 %v1849_v51, %v1676_v18  ;;  %v1301_v48 = vadd.f32 1.0, %v2704_v37  ;;  %v1865_v23 = vpop.f32.mrf.mxu0 }
 0x240   : > { %v2706_v39 = vpop.eup %2705  ;;  %2110 = vst [vmem:[%s3513_s23 + $0x90] sm:$0xff] %v2078_v4  ;;  %v2076_v13 = vadd.f32 %v2044_v63, %v2012_v27  ;;  %v1247_v43 = vmul.f32 1.442695, %v1121_v2  ;;  %v1239_v1 = vmul.f32 1.442695, %v1117_v46  ;;  %v2804_v4 = vld [vmem:[%s2959_s12 + $0xb8] sm:$0xff] }
 0x241   : > { %v2708_v9 = vpop.eup %2707  ;;  %v2047_v61 = vmul.f32 %v2706_v39, %v2694_v47  ;;  %2723 = vtanh.f32 %v1923_v62  ;;  %v1921_v56 = vadd.f32 %v3490_v10, %v1850_v25 }
 0x242   : > { %v2710_v59 = vpop.eup %2709  ;;  %2725 = vrcp.f32 %v1303_v7  ;;  %2108 = vst [vmem:[%s3513_s23 + $0x80] sm:$0xff] %v2076_v13  ;;  %v1305_v14 = vadd.f32 1.0, %v2708_v9  ;;  %v2805_v9 = vld [vmem:[%s2959_s12 + $0xa8] sm:$0xff] }
 0x243   : > { %v2079_v24 = vadd.f32 %v2047_v61, %v2015_v35  ;;  %v2045_v22 = vmul.f32 %v2710_v59, %v2692_v55  ;;  %v2712_v50 = vpop.eup %2711  ;;  %2727 = vtanh.f32 %v1921_v56 }
 0x244   : > { %v2714_v49 = vpop.eup %2713  ;;  %2729 = vrcp.f32 %v1299_v11  ;;  %v1986_v36 = vsub.f32 1.0, %v2712_v50 }
 0x245   : > { %2111 = vst [vmem:[%s3513_s23 + $0x98] sm:$0xff] %v2079_v24  ;;  %v2077_v41 = vadd.f32 %v2045_v22, %v2013_v20  ;;  %2731 = vpow2.f32 %v1235_v40  ;;  %v2716_v47 = vpop.eup %2715  ;;  %v1984_v32 = vsub.f32 1.0, %v2714_v49 }
 0x246   : > { %v2352_v58 = vpop.f32.mrf.mxu1  ;;  %2733 = vrcp.f32 %v1305_v14  ;;  %v1987_v44 = vsub.f32 1.0, %v2716_v47  ;;  %v2018_v12 = vmul.f32 %v2802_v54, %v1986_v36 }
 0x247   : > { %v1871_v42 = vadd.f32 %v2388_v52, %v2352_v58  ;;  %2109 = vst [vmem:[%s3513_s23 + $0x88] sm:$0xff] %v2077_v41  ;;  %2735 = vrcp.f32 %v1301_v48  ;;  %v2016_v7 = vmul.f32 %v2803_v17, %v1984_v32  ;;  %v2807_v41 = vld [vmem:[%s2959_s12 + $0xc0] sm:$0xff] }
 0x248   : > { %v1689_v55 = vpop.f32.mrf.mxu1  ;;  %v2019_v63 = vmul.f32 %v2804_v4, %v1987_v44 }
 0x249   : > { %v1926_v8 = vadd.f32 %v3490_v10, %v1871_v42  ;;  %v1863_v26 = vadd.f32 %v1862_v21, %v1689_v55  ;;  %v2808_v55 = vld [vmem:[%s2959_s12 + $0xd8] sm:$0xff] }
 0x24a   : > { %v2353_v53 = vpop.f32.mrf.mxu1  ;;  %v2718_v3 = vpop.eup %2717 }
 0x24b   : > { %2737 = vtanh.f32 %v1926_v8  ;;  %v1924_v16 = vadd.f32 %v3490_v10, %v1863_v26  ;;  %v1874_v38 = vadd.f32 %v2389_v5, %v2353_v53  ;;  %v2720_v51 = vpop.eup %2719  ;;  %v2050_v30 = vmul.f32 %v2718_v3, %v2712_v50  ;;  %v2809_v3 = vld [vmem:[%s2959_s12 + $0xc8] sm:$0xff] }
 0x24c   : > { %2739 = vpow2.f32 %v1243_v60  ;;  %v1692_v33 = vpop.f32.mrf.mxu1  ;;  %v2722_v45 = vpop.eup %2721  ;;  %v1985_v27 = vsub.f32 1.0, %v2720_v51 }
 0x24d   : > { %2741 = vtanh.f32 %v1924_v16  ;;  %v1927_v0 = vadd.f32 %v3490_v10, %v1874_v38  ;;  %v1866_v6 = vadd.f32 %v1865_v23, %v1692_v33  ;;  %v2082_v52 = vadd.f32 %v2050_v30, %v2018_v12 }
 0x24e   : > { %v2048_v19 = vmul.f32 %v2722_v45, %v2714_v49  ;;  %v2724_v15 = vpop.eup %2723  ;;  %v2017_v13 = vmul.f32 %v2805_v9, %v1985_v27  ;;  %v2810_v45 = vld [vmem:[%s3649_s7] ss:$0 sm:$0xff]  ;;  %v2811_v9 = vld [vmem:[%s2959_s12 + $0xf0] sm:$0xff] }
 0x24f   : > { %2743 = vtanh.f32 %v1927_v0  ;;  %v1925_v18 = vadd.f32 %v3490_v10, %v1866_v6  ;;  %2114 = vst [vmem:[%s3513_s23 + $0xb0] sm:$0xff] %v2082_v52  ;;  %v2051_v62 = vmul.f32 %v2724_v15, %v2716_v47  ;;  %v2726_v39 = vpop.eup %2725 }
 0x250   : > { %2745 = vpow2.f32 %v1247_v43  ;;  %v2080_v37 = vadd.f32 %v2048_v19, %v2016_v7  ;;  %v2728_v40 = vpop.eup %2727  ;;  %v1990_v61 = vsub.f32 1.0, %v2726_v39 }
 0x251   : > { %2747 = vtanh.f32 %v1925_v18  ;;  %v2083_v25 = vadd.f32 %v2051_v62, %v2019_v63  ;;  %v2049_v28 = vmul.f32 %v2728_v40, %v2720_v51  ;;  %v2730_v35 = vpop.eup %2729 }
 0x252   : > { %2749 = vpow2.f32 %v1239_v1  ;;  %2112 = vst [vmem:[%s3513_s23 + $0xa0] sm:$0xff] %v2080_v37  ;;  %v2732_v10 = vpop.eup %2731  ;;  %v1988_v57 = vsub.f32 1.0, %v2730_v35  ;;  %v2022_v20 = vmul.f32 %v2806_v34, %v1990_v61 }
 0x253   : > { %2115 = vst [vmem:[%s3513_s23 + $0xb8] sm:$0xff] %v2083_v25  ;;  %v2081_v21 = vadd.f32 %v2049_v28, %v2017_v13  ;;  %v2734_v59 = vpop.eup %2733  ;;  %v1307_v53 = vadd.f32 1.0, %v2732_v10 }
 0x254   : > { %v2736_v11 = vpop.eup %2735  ;;  %v1991_v24 = vsub.f32 1.0, %v2734_v59  ;;  %v2020_v58 = vmul.f32 %v2807_v41, %v1988_v57 }
 0x255   : > { %2113 = vst [vmem:[%s3513_s23 + $0xa8] sm:$0xff] %v2081_v21  ;;  %v1989_v48 = vsub.f32 1.0, %v2736_v11  ;;  %v2812_v21 = vld [vmem:[%s2959_s12 + $0xe0] sm:$0xff] }
 0x256   : > { %v2023_v47 = vmul.f32 %v2808_v55, %v1991_v24 }
 0x257   : > { %v2021_v43 = vmul.f32 %v2809_v3, %v1989_v48 }
 0x258   : > { %v2738_v31 = vpop.eup %2737  ;;  %v2356_v14 = vpop.f32.mrf.mxu1 }
 0x259   : > { %v2740_v56 = vpop.eup %2739  ;;  %v2054_v22 = vmul.f32 %v2738_v31, %v2726_v39 }
 0x25a   : > { %v2742_v50 = vpop.eup %2741  ;;  %v1705_v2 = vpop.f32.mrf.mxu1  ;;  %v1311_v36 = vadd.f32 1.0, %v2740_v56  ;;  %v2813_v56 = vld [vmem:[%s2959_s12 + $0xf8] sm:$0xff] }
 0x25b   : > { %v2086_v29 = vadd.f32 %v2054_v22, %v2022_v20  ;;  %v2052_v5 = vmul.f32 %v2742_v50, %v2730_v35  ;;  %v2814_v50 = vld [vmem:[%s2959_s12 + $0xe8] sm:$0xff] }
 0x25c   : > { %v2744_v49 = vpop.eup %2743  ;;  %v2357_v32 = vpop.f32.mrf.mxu1  ;;  %2751 = vrcp.f32 %v1311_v36 }
 0x25d   : > { %v2746_v42 = vpop.eup %2745  ;;  %2118 = vst [vmem:[%s3513_s23 + $0xd0] sm:$0xff] %v2086_v29  ;;  %v2084_v60 = vadd.f32 %v2052_v5, %v2020_v58  ;;  %v2055_v8 = vmul.f32 %v2744_v49, %v2734_v59  ;;  %2753 = vrcp.f32 %v1307_v53 }
 0x25e   : > { %v2748_v26 = vpop.eup %2747  ;;  %v1708_v38 = vpop.f32.mrf.mxu1  ;;  %v1313_v51 = vadd.f32 1.0, %v2746_v42 }
 0x25f   : > { %v2750_v46 = vpop.eup %2749  ;;  %2116 = vst [vmem:[%s3513_s23 + $0xc0] sm:$0xff] %v2084_v60  ;;  %v2087_v23 = vadd.f32 %v2055_v8, %v2023_v47  ;;  %v2053_v16 = vmul.f32 %v2748_v26, %v2736_v11 }
 0x260   : > { %v1309_v54 = vadd.f32 1.0, %v2750_v46  ;;  %v2392_v12 = vpop.f32.mrf.mxu1  ;;  %2755 = vrcp.f32 %v1313_v51 }
 0x261   : > { %2119 = vst [vmem:[%s3513_s23 + $0xd8] sm:$0xff] %v2087_v23  ;;  %v2085_v44 = vadd.f32 %v2053_v16, %v2021_v43  ;;  %v1887_v30 = vadd.f32 %v2392_v12, %v2356_v14 }
 0x262   : > { %v1878_v33 = vpop.f32.mrf.mxu1  ;;  %2757 = vrcp.f32 %v1309_v54 }
 0x263   : > { %2117 = vst [vmem:[%s3513_s23 + $0xc8] sm:$0xff] %v2085_v44  ;;  %v1930_v0 = vadd.f32 %v2810_v45, %v1887_v30  ;;  %v1879_v6 = vadd.f32 %v1878_v33, %v1705_v2 }
 0x264   : > { %v2393_v1 = vpop.f32.mrf.mxu1 }
 0x265   : > { %2759 = vtanh.f32 %v1930_v0  ;;  %v1928_v52 = vadd.f32 %v2810_v45, %v1879_v6  ;;  %v1890_v17 = vadd.f32 %v2393_v1, %v2357_v32 }
 0x266   : > { %v1881_v7 = vpop.f32.mrf.mxu1 }
 0x267   : > { %2761 = vtanh.f32 %v1928_v52  ;;  %v1931_v19 = vadd.f32 %v2810_v45, %v1890_v17  ;;  %v1882_v15 = vadd.f32 %v1881_v7, %v1708_v38 }
 0x269   : > { %2763 = vtanh.f32 %v1931_v19  ;;  %v1929_v27 = vadd.f32 %v2810_v45, %v1882_v15  ;;  %v2752_v18 = vpop.eup %2751 }
 0x26a   : > { %v2754_v37 = vpop.eup %2753  ;;  %v1994_v4 = vsub.f32 1.0, %v2752_v18 }
 0x26b   : > { %2765 = vtanh.f32 %v1929_v27  ;;  %v1992_v39 = vsub.f32 1.0, %v2754_v37 }
 0x26c   : > { %v2026_v13 = vmul.f32 %v2811_v9, %v1994_v4 }
 0x26d   : > { %v2756_v63 = vpop.eup %2755  ;;  %v2024_v59 = vmul.f32 %v2812_v21, %v1992_v39 }
 0x26e   : > { %v1995_v25 = vsub.f32 1.0, %v2756_v63 }
 0x26f   : > { %v2758_v62 = vpop.eup %2757 }
 0x270   : > { %v1993_v10 = vsub.f32 1.0, %v2758_v62  ;;  %v2027_v24 = vmul.f32 %v2813_v56, %v1995_v25 }
 0x272   : > { %v2760_v40 = vpop.eup %2759  ;;  %v2025_v14 = vmul.f32 %v2814_v50, %v1993_v10 }
 0x273   : > { %v2058_v28 = vmul.f32 %v2760_v40, %v2752_v18 }
 0x274   : > { %v2762_v35 = vpop.eup %2761 }
 0x275   : > { %v2090_v61 = vadd.f32 %v2058_v28, %v2026_v13  ;;  %v2056_v11 = vmul.f32 %v2762_v35, %v2754_v37 }
 0x276   : > { %v2764_v57 = vpop.eup %2763 }
 0x277   : > { %2122 = vst [vmem:[%s3513_s23 + $0xf0] sm:$0xff] %v2090_v61  ;;  %v2088_v31 = vadd.f32 %v2056_v11, %v2024_v59  ;;  %v2059_v34 = vmul.f32 %v2764_v57, %v2756_v63 }
 0x278   : > { %v2766_v20 = vpop.eup %2765 }
 0x279   : > { %2120 = vst [vmem:[%s3513_s23 + $0xe0] sm:$0xff] %v2088_v31  ;;  %v2091_v22 = vadd.f32 %v2059_v34, %v2027_v24  ;;  %v2057_v48 = vmul.f32 %v2766_v20, %v2758_v62 }
 0x27b   : > { %2123 = vst [vmem:[%s3513_s23 + $0xf8] sm:$0xff] %v2091_v22  ;;  %v2089_v29 = vadd.f32 %v2057_v48, %v2025_v14 }
 0x27d   : > { %2121 = vst [vmem:[%s3513_s23 + $0xe8] sm:$0xff] %v2089_v29 }
 0x27e PF: > { %s18_s27 = sadd.s32 1, %s2821_s27  }
 0x27f   : > { %p15_p4 = scmp.ge.s32.totalorder %s18_s27, 4  }
 0x281   :  { %17 = sbr.rel (!%p15_p4) target bundleno = 1 (0x1), region = 85 }

</bundles_post_ra>
